<compile_context>
chip_gen: v6e
topology: v6e:2x2x1
jax: 0.10.0
libtpu: 0.0.40
codegen_flags: <defaults>
</compile_context>

<pallas_src>
import functools
import math

import jax
import jax.numpy as jnp
from jax.experimental import pallas as pl
from jax.experimental.pallas import tpu as pltpu


# Leave headroom for Mosaic scratch / semaphores / double-buffered windows
# (v7x has only 64 MiB VMEM per TensorCore).
_VMEM_LIMIT = 48 * 1024 * 1024


def _round_up(n, m):
    return ((n + m - 1) // m) * m


def _pad2d(a, rows, cols):
    return jnp.pad(a, ((0, rows - a.shape[0]), (0, cols - a.shape[1])))


# -----------------------------------------------------------------------------
# Kernel 1: tiled dense layer   y = [relu](x @ W + b), padded rows zeroed.
#   grid: (M // tm,) row blocks, "parallel"; W and b VMEM-resident.
# -----------------------------------------------------------------------------
def _linear_kernel(x_ref, w_ref, b_ref, o_ref, *, relu, n_valid, tm, precision):
    acc = jnp.dot(x_ref[...], w_ref[...],
                  preferred_element_type=jnp.float32, precision=precision)
    acc = acc + b_ref[...]
    if relu:
        acc = jnp.maximum(acc, 0.0)
    # Keep padded node rows exactly zero (robustness: no relu(bias) garbage).
    row = jax.lax.broadcasted_iota(jnp.int32, acc.shape, 0) + pl.program_id(0) * tm
    acc = jnp.where(row < n_valid, acc, 0.0)
    o_ref[...] = acc.astype(o_ref.dtype)


def linear(x, w, b, *, relu, out_dtype, n_valid, precision, tm=256):
    m, k = x.shape
    _, n = w.shape
    assert m % tm == 0
    # TODO(synk): add a K-reduction grid axis for very large feature sizes
    # (keeps the working set bounded under v7x's 64 MiB VMEM).
    return pl.pallas_call(
        functools.partial(_linear_kernel, relu=relu, n_valid=n_valid, tm=tm,
                          precision=precision),
        out_shape=jax.ShapeDtypeStruct((m, n), out_dtype),
        grid_spec=pltpu.PrefetchScalarGridSpec(
            num_scalar_prefetch=0,
            grid=(m // tm,),
            in_specs=[
                pl.BlockSpec((tm, k), lambda i: (i, 0)),
                pl.BlockSpec((k, n), lambda i: (0, 0)),   # resident weights
                pl.BlockSpec((1, n), lambda i: (0, 0)),   # resident bias
            ],
            out_specs=pl.BlockSpec((tm, n), lambda i: (i, 0)),
        ),
        compiler_params=pltpu.CompilerParams(
            dimension_semantics=("parallel",),
            vmem_limit_bytes=_VMEM_LIMIT),
    )(x, w, b)


# -----------------------------------------------------------------------------
# Kernel 2: fused GCN layer   y = relu(A_norm @ (h @ W) + b)
#   grid: (M // tm, num_nonzero_blocks)  row blocks "parallel", reduction last.
#   Scalar-prefetched block ids give a block-sparse A stream; h @ W is computed
#   per reduction block inside the kernel (W resident), so hW never hits HBM.
# -----------------------------------------------------------------------------
def _gcn_layer_kernel(bids_ref, cnts_ref, a_ref, h_ref, w_ref, b_ref, o_ref,
                      acc_ref, *, relu, n_valid, tm, precision):
    i = pl.program_id(0)
    j = pl.program_id(1)

    @pl.when(j == 0)
    def _init():
        acc_ref[...] = jnp.zeros_like(acc_ref)

    # Only the first cnts[i] column-blocks of row block i are nonzero; padded
    # grid steps fetch an (already-seen) block and skip the MXU work.
    @pl.when(j < cnts_ref[i])
    def _accumulate():
        hw = jnp.dot(h_ref[...], w_ref[...],
                     preferred_element_type=jnp.float32, precision=precision)
        hw = hw.astype(h_ref.dtype)
        acc_ref[...] += jnp.dot(a_ref[...], hw,
                                preferred_element_type=jnp.float32,
                                precision=precision)

    @pl.when(j == pl.num_programs(1) - 1)
    def _finalize():
        out = acc_ref[...] + b_ref[...]
        if relu:
            out = jnp.maximum(out, 0.0)
        row = jax.lax.broadcasted_iota(jnp.int32, out.shape, 0) + i * tm
        out = jnp.where(row < n_valid, out, 0.0)
        o_ref[...] = out.astype(o_ref.dtype)


def gcn_layer(a, h, w, b, block_ids, counts, num_j, *, relu, out_dtype,
              n_valid, precision, tm=256, tk=256):
    m, k = a.shape
    hid = h.shape[1]
    assert m % tm == 0 and k % tk == 0
    return pl.pallas_call(
        functools.partial(_gcn_layer_kernel, relu=relu, n_valid=n_valid, tm=tm,
                          precision=precision),
        out_shape=jax.ShapeDtypeStruct((m, hid), out_dtype),
        grid_spec=pltpu.PrefetchScalarGridSpec(
            num_scalar_prefetch=2,
            grid=(m // tm, num_j),
            in_specs=[
                # A tile: only nonzero column-blocks of row block i are visited.
                pl.BlockSpec((tm, tk), lambda i, j, bids, cnts: (i, bids[i, j])),
                # Matching row block of h (fused h @ W; no hW in HBM).
                pl.BlockSpec((tk, hid), lambda i, j, bids, cnts: (bids[i, j], 0)),
                # TODO(synk): pipeline_mode=pl.Buffered(1) on the resident W/b
                # to halve their VMEM footprint on v7x at large hidden sizes.
                pl.BlockSpec((hid, hid), lambda i, j, bids, cnts: (0, 0)),
                pl.BlockSpec((1, hid), lambda i, j, bids, cnts: (0, 0)),
            ],
            out_specs=pl.BlockSpec((tm, hid), lambda i, j, bids, cnts: (i, 0)),
            scratch_shapes=[pltpu.VMEM((tm, hid), jnp.float32)],
        ),
        compiler_params=pltpu.CompilerParams(
            dimension_semantics=("parallel", "arbitrary"),
            vmem_limit_bytes=_VMEM_LIMIT),
    )(block_ids, counts, a, h, w, b)


# -----------------------------------------------------------------------------
# Block-sparsity metadata for the adjacency: per row block, the (compacted)
# list of nonzero column-block indices + their count.  Computed eagerly.
# -----------------------------------------------------------------------------
def block_sparsity(a_pad, tm, tk):
    m, k = a_pad.shape
    mb, kb = m // tm, k // tk
    nz = jnp.any(a_pad.reshape(mb, tm, kb, tk) != 0, axis=(1, 3))     # (mb, kb)
    counts = jnp.sum(nz, axis=1).astype(jnp.int32)                    # (mb,)
    col = jnp.arange(kb, dtype=jnp.int32)
    keys = jnp.where(nz, col[None, :], kb + col[None, :])             # unique keys
    order = jnp.argsort(keys, axis=1).astype(jnp.int32)               # nonzero first
    num_j = max(int(jnp.max(counts)), 1)                              # static extent
    return order[:, :num_j], counts, num_j


# -----------------------------------------------------------------------------
# Full GraphNet forward (eval mode):
#   in_nn + ReLU -> n_layers x [ relu(A_norm @ (h @ W_l) + b_l) ] -> out_nn
# Lane-dense padding done here; heavy math in the Pallas kernels.
# TODO(synk): for tiny instances, fuse the whole forward into one pallas_call
# with all weights and h kept VMEM-resident (removes all launch overhead).
# TODO(synk): fold the D^-1/2 GCN normalization into the aggregate kernel
# instead of materializing the normalized dense A in an extra XLA pass.
# -----------------------------------------------------------------------------
def graphnet_forward(x, a_norm, w_in, b_in, w_layers, b_layers, w_out, b_out,
                     *, compute_dtype=jnp.float32, precision=None,
                     tm=256, tk=256):
    n_nodes, f_in = x.shape
    n_hidden = w_in.shape[1]
    n_classes = w_out.shape[1]
    n_layers = w_layers.shape[0]

    n_pad = _round_up(n_nodes, math.lcm(tm, tk))
    f_pad = _round_up(f_in, 128)
    h_pad = _round_up(n_hidden, 128)
    c_pad = _round_up(n_classes, 128)

    cd = compute_dtype
    x_p = _pad2d(x, n_pad, f_pad).astype(cd)
    a_f32 = _pad2d(a_norm, n_pad, n_pad)
    block_ids, counts, num_j = block_sparsity(a_f32, tm, tk)
    a_p = a_f32.astype(cd)
    w_in_p = _pad2d(w_in, f_pad, h_pad).astype(cd)
    b_in_p = _pad2d(b_in, 1, h_pad).astype(jnp.float32)
    w_out_p = _pad2d(w_out, h_pad, c_pad).astype(cd)
    b_out_p = _pad2d(b_out, 1, c_pad).astype(jnp.float32)
    w_l_p = [_pad2d(w_layers[l], h_pad, h_pad).astype(cd) for l in range(n_layers)]
    b_l_p = [_pad2d(b_layers[l], 1, h_pad).astype(jnp.float32) for l in range(n_layers)]

    # in_nn + ReLU.  TODO(synk): in_dropout is identity (eval-mode semantics).
    h = linear(x_p, w_in_p, b_in_p, relu=True, out_dtype=cd,
               n_valid=n_nodes, precision=precision, tm=tm)

    # GCNConv layers: one fused kernel per layer.
    for l in range(n_layers):
        h = gcn_layer(a_p, h, w_l_p[l], b_l_p[l], block_ids, counts, num_j,
                      relu=True, out_dtype=cd, n_valid=n_nodes,
                      precision=precision, tm=tm, tk=tk)

    # out_nn.  TODO(synk): out_dropout is identity (eval-mode semantics).
    out = linear(h, w_out_p, b_out_p, relu=False, out_dtype=jnp.float32,
                 n_valid=n_nodes, precision=precision, tm=tm)
    return out[:n_nodes, :n_classes]


# -----------------------------------------------------------------------------
# Glue: GCN-normalized dense adjacency from edge_index / edge_weight.
# -----------------------------------------------------------------------------
def gcn_norm_adjacency(edge_index, edge_weight, n_nodes):
    src, dst = edge_index
    a = jnp.zeros((n_nodes, n_nodes), jnp.float32).at[dst, src].add(edge_weight)
    a = a + jnp.eye(n_nodes, dtype=jnp.float32)            # add self-loops
    deg = jnp.sum(a, axis=1)
    d_inv_sqrt = jnp.where(deg > 0, 1.0 / jnp.sqrt(deg), 0.0)
    return d_inv_sqrt[:, None] * a * d_inv_sqrt[None, :]


# Pure-JAX references for correctness checking.
def graphnet_ref_f32(x, a, w_in, b_in, w_layers, b_layers, w_out, b_out,
                     precision=None):
    dot = lambda p, q: jnp.dot(p, q, precision=precision)
    h = jnp.maximum(dot(x, w_in) + b_in, 0.0)
    for l in range(w_layers.shape[0]):
        h = jnp.maximum(dot(a, dot(h, w_layers[l])) + b_layers[l], 0.0)
    return dot(h, w_out) + b_out


def graphnet_ref_bf16(x, a, w_in, b_in, w_layers, b_layers, w_out, b_out):
    # Precision-matched to the bf16 kernel path (bf16 operands, f32 accumulate).
    bf = lambda t: t.astype(jnp.bfloat16)
    dot = lambda p, q: jnp.dot(bf(p), bf(q), preferred_element_type=jnp.float32)
    h = jnp.maximum(dot(x, w_in) + b_in, 0.0)
    for l in range(w_layers.shape[0]):
        hw = dot(h, w_layers[l])
        h = jnp.maximum(dot(a, hw) + b_layers[l], 0.0)
    return dot(h, w_out) + b_out


if __name__ == "__main__":
    # Small, deterministic instantiation: input_size=8 (>1, so no embedding),
    # n_hidden=32, n_layers=2, n_classes=4, n_nodes=200 (padded to 256).
    N_NODES, F_IN, HIDDEN, N_LAYERS, N_CLASSES = 200, 8, 32, 2, 4

    key = jax.random.PRNGKey(0)
    kx, kwi, kbi, kwl, kbl, kwo, kbo, kew = jax.random.split(key, 8)

    x = jax.random.normal(kx, (N_NODES, F_IN), jnp.float32)

    # Deterministic ring graph (both directions) with random positive weights.
    idx = jnp.arange(N_NODES)
    src = jnp.concatenate([idx, (idx + 1) % N_NODES])
    dst = jnp.concatenate([(idx + 1) % N_NODES, idx])
    edge_index = jnp.stack([src, dst])
    edge_weight = jax.random.uniform(kew, (edge_index.shape[1],),
                                     jnp.float32, 0.5, 1.5)
    a_norm = gcn_norm_adjacency(edge_index, edge_weight, N_NODES)

    # Parameters (deterministic, scaled-normal init; biases kept 2D for TPU).
    w_in = jax.random.normal(kwi, (F_IN, HIDDEN), jnp.float32) * 0.3
    b_in = jax.random.normal(kbi, (1, HIDDEN), jnp.float32) * 0.05
    w_layers = jax.random.normal(kwl, (N_LAYERS, HIDDEN, HIDDEN), jnp.float32) * 0.3
    b_layers = jax.random.normal(kbl, (N_LAYERS, 1, HIDDEN), jnp.float32) * 0.05
    w_out = jax.random.normal(kwo, (HIDDEN, N_CLASSES), jnp.float32) * 0.3
    b_out = jax.random.normal(kbo, (1, N_CLASSES), jnp.float32) * 0.05

    args = (x, a_norm, w_in, b_in, w_layers, b_layers, w_out, b_out)

    # f32 path (module-accurate): fp32 MXU contractions, tight check vs the
    # full-f32 module semantics.
    try:
        out_f32 = graphnet_forward(*args, compute_dtype=jnp.float32,
                                   precision=jax.lax.Precision.HIGHEST)
    except Exception:
        # TODO(synk): fallback if this build rejects fp32 contract precision.
        out_f32 = graphnet_forward(*args, compute_dtype=jnp.float32,
                                   precision=None)
    out_f32 = jax.block_until_ready(out_f32)
    ref_f32 = graphnet_ref_f32(*args, precision=jax.lax.Precision.HIGHEST)
    assert out_f32.shape == (N_NODES, N_CLASSES)
    assert jnp.allclose(out_f32, ref_f32, atol=5e-3, rtol=5e-3), \
        float(jnp.max(jnp.abs(out_f32 - ref_f32)))

    # bf16 fast path (half the HBM traffic on the streamed A / h): checked
    # against the precision-matched (bf16 operand / f32 accumulate) reference.
    out_bf16 = graphnet_forward(*args, compute_dtype=jnp.bfloat16,
                                precision=None)
    out_bf16 = jax.block_until_ready(out_bf16)
    ref_bf16 = graphnet_ref_bf16(*args)
    assert out_bf16.shape == (N_NODES, N_CLASSES)
    assert jnp.allclose(out_bf16, ref_bf16, atol=2e-2, rtol=2e-2), \
        float(jnp.max(jnp.abs(out_bf16 - ref_bf16)))

    print("KERNEL_OK")
</pallas_src>

<mosaic_0001>
module attributes {stable_mosaic.version = 11 : i64} {
  func.func @_linear_kernel(%arg0: i32, %arg1: memref<256x128xf32, #tpu.memory_space<vmem>>, %arg2: memref<128x128xf32, #tpu.memory_space<vmem>>, %arg3: memref<1x128xf32, #tpu.memory_space<vmem>>, %arg4: memref<256x128xf32, #tpu.memory_space<vmem>>) attributes {dimension_semantics = [#tpu.dimension_semantics<parallel>], iteration_bounds = array<i64: 1>, scalar_prefetch = 0 : i64, scratch_operands = 0 : i64, tpu.core_type = #tpu.core_type<tc>, window_params = [{transform_indices = @transform_0, window_bounds = array<i64: 256, 128>}, {pipeline_mode = #tpu.pipeline_mode<synchronous>, transform_indices = @transform_1, window_bounds = array<i64: 128, 128>}, {pipeline_mode = #tpu.pipeline_mode<synchronous>, transform_indices = @transform_2, window_bounds = array<i64: 1, 128>}, {transform_indices = @transform_3, window_bounds = array<i64: 256, 128>}]} {
    %c0 = arith.constant 0 : index
    %c0_0 = arith.constant 0 : index
    %0 = vector.load %arg1[%c0, %c0_0] : memref<256x128xf32, #tpu.memory_space<vmem>>, vector<256x128xf32>
    %c0_1 = arith.constant 0 : index
    %c0_2 = arith.constant 0 : index
    %1 = vector.load %arg2[%c0_1, %c0_2] : memref<128x128xf32, #tpu.memory_space<vmem>>, vector<128x128xf32>
    %cst = arith.constant dense<0.000000e+00> : vector<256x128xf32>
    %2 = tpu.matmul %0, %1, %cst {dimension_numbers = #tpu.dot_dimension_numbers<[1], [0], [0], [1], [0, 0, 1, 1], [], []>, precision = #tpu.contract_precision<fp32>} : vector<256x128xf32>, vector<128x128xf32>, vector<256x128xf32> -> vector<256x128xf32>
    %c0_3 = arith.constant 0 : index
    %c0_4 = arith.constant 0 : index
    %3 = vector.load %arg3[%c0_3, %c0_4] : memref<1x128xf32, #tpu.memory_space<vmem>>, vector<1x128xf32>
    %4 = vector.broadcast %3 : vector<1x128xf32> to vector<256x128xf32>
    %5 = arith.addf %2, %4 : vector<256x128xf32>
    %cst_5 = arith.constant 0.000000e+00 : f32
    %6 = vector.broadcast %cst_5 : f32 to vector<256x128xf32>
    %7 = arith.maximumf %5, %6 : vector<256x128xf32>
    %8 = tpu.iota {dimensions = array<i32: 0>} : vector<256x128xi32>
    %c256_i32 = arith.constant 256 : i32
    %9 = arith.muli %arg0, %c256_i32 : i32
    %10 = vector.broadcast %9 : i32 to vector<256x128xi32>
    %11 = arith.addi %8, %10 : vector<256x128xi32>
    %c200_i32 = arith.constant 200 : i32
    %12 = vector.broadcast %c200_i32 : i32 to vector<256x128xi32>
    %13 = arith.cmpi slt, %11, %12 : vector<256x128xi32>
    %cst_6 = arith.constant 0.000000e+00 : f32
    %14 = vector.broadcast %cst_6 : f32 to vector<256x128xf32>
    %15 = arith.select %13, %7, %14 : vector<256x128xi1>, vector<256x128xf32>
    %c0_7 = arith.constant 0 : index
    %c0_8 = arith.constant 0 : index
    %16 = vector.load %arg4[%c0_7, %c0_8] : memref<256x128xf32, #tpu.memory_space<vmem>>, vector<256x128xf32>
    tpu.vector_store %arg4[%c0_7, %c0_8], %15 {strides = array<i32>} : memref<256x128xf32, #tpu.memory_space<vmem>>, vector<256x128xf32>,
    return
  }
  func.func @transform_0(%arg0: i32) -> (i32, i32) {
    %c0_i32 = arith.constant 0 : i32
    %c0_i32_0 = arith.constant 0 : i32
    return %arg0, %c0_i32 : i32, i32
  }
  func.func @transform_1(%arg0: i32) -> (i32, i32) {
    %c0_i32 = arith.constant 0 : i32
    %c0_i32_0 = arith.constant 0 : i32
    %c0_i32_1 = arith.constant 0 : i32
    return %c0_i32, %c0_i32_0 : i32, i32
  }
  func.func @transform_2(%arg0: i32) -> (i32, i32) {
    %c0_i32 = arith.constant 0 : i32
    %c0_i32_0 = arith.constant 0 : i32
    %c0_i32_1 = arith.constant 0 : i32
    return %c0_i32, %c0_i32_0 : i32, i32
  }
  func.func @transform_3(%arg0: i32) -> (i32, i32) {
    %c0_i32 = arith.constant 0 : i32
    %c0_i32_0 = arith.constant 0 : i32
    return %arg0, %c0_i32 : i32, i32
  }
}

module attributes {stable_mosaic.version = 11 : i64} {
  func.func @_linear_kernel(%arg0: i32, %arg1: memref<256x128xf32, #tpu.memory_space<vmem>>, %arg2: memref<128x128xf32, #tpu.memory_space<vmem>>, %arg3: memref<1x128xf32, #tpu.memory_space<vmem>>, %arg4: memref<256x128xf32, #tpu.memory_space<vmem>>) attributes {dimension_semantics = [#tpu.dimension_semantics<parallel>], iteration_bounds = array<i64: 1>, scalar_prefetch = 0 : i64, scratch_operands = 0 : i64, tpu.core_type = #tpu.core_type<tc>, window_params = [{transform_indices = @transform_0, window_bounds = array<i64: 256, 128>}, {pipeline_mode = #tpu.pipeline_mode<synchronous>, transform_indices = @transform_1, window_bounds = array<i64: 128, 128>}, {pipeline_mode = #tpu.pipeline_mode<synchronous>, transform_indices = @transform_2, window_bounds = array<i64: 1, 128>}, {transform_indices = @transform_3, window_bounds = array<i64: 256, 128>}]} {
    %c0 = arith.constant 0 : index
    %c0_0 = arith.constant 0 : index
    %0 = vector.load %arg1[%c0, %c0_0] : memref<256x128xf32, #tpu.memory_space<vmem>>, vector<256x128xf32>
    %c0_1 = arith.constant 0 : index
    %c0_2 = arith.constant 0 : index
    %1 = vector.load %arg2[%c0_1, %c0_2] : memref<128x128xf32, #tpu.memory_space<vmem>>, vector<128x128xf32>
    %cst = arith.constant dense<0.000000e+00> : vector<256x128xf32>
    %2 = tpu.matmul %0, %1, %cst {dimension_numbers = #tpu.dot_dimension_numbers<[1], [0], [0], [1], [0, 0, 1, 1], [], []>} : vector<256x128xf32>, vector<128x128xf32>, vector<256x128xf32> -> vector<256x128xf32>
    %c0_3 = arith.constant 0 : index
    %c0_4 = arith.constant 0 : index
    %3 = vector.load %arg3[%c0_3, %c0_4] : memref<1x128xf32, #tpu.memory_space<vmem>>, vector<1x128xf32>
    %4 = vector.broadcast %3 : vector<1x128xf32> to vector<256x128xf32>
    %5 = arith.addf %2, %4 : vector<256x128xf32>
    %cst_5 = arith.constant 0.000000e+00 : f32
    %6 = vector.broadcast %cst_5 : f32 to vector<256x128xf32>
    %7 = arith.maximumf %5, %6 : vector<256x128xf32>
    %8 = tpu.iota {dimensions = array<i32: 0>} : vector<256x128xi32>
    %c256_i32 = arith.constant 256 : i32
    %9 = arith.muli %arg0, %c256_i32 : i32
    %10 = vector.broadcast %9 : i32 to vector<256x128xi32>
    %11 = arith.addi %8, %10 : vector<256x128xi32>
    %c200_i32 = arith.constant 200 : i32
    %12 = vector.broadcast %c200_i32 : i32 to vector<256x128xi32>
    %13 = arith.cmpi slt, %11, %12 : vector<256x128xi32>
    %cst_6 = arith.constant 0.000000e+00 : f32
    %14 = vector.broadcast %cst_6 : f32 to vector<256x128xf32>
    %15 = arith.select %13, %7, %14 : vector<256x128xi1>, vector<256x128xf32>
    %c0_7 = arith.constant 0 : index
    %c0_8 = arith.constant 0 : index
    %16 = vector.load %arg4[%c0_7, %c0_8] : memref<256x128xf32, #tpu.memory_space<vmem>>, vector<256x128xf32>
    tpu.vector_store %arg4[%c0_7, %c0_8], %15 {strides = array<i32>} : memref<256x128xf32, #tpu.memory_space<vmem>>, vector<256x128xf32>,
    return
  }
  func.func @transform_0(%arg0: i32) -> (i32, i32) {
    %c0_i32 = arith.constant 0 : i32
    %c0_i32_0 = arith.constant 0 : i32
    return %arg0, %c0_i32 : i32, i32
  }
  func.func @transform_1(%arg0: i32) -> (i32, i32) {
    %c0_i32 = arith.constant 0 : i32
    %c0_i32_0 = arith.constant 0 : i32
    %c0_i32_1 = arith.constant 0 : i32
    return %c0_i32, %c0_i32_0 : i32, i32
  }
  func.func @transform_2(%arg0: i32) -> (i32, i32) {
    %c0_i32 = arith.constant 0 : i32
    %c0_i32_0 = arith.constant 0 : i32
    %c0_i32_1 = arith.constant 0 : i32
    return %c0_i32, %c0_i32_0 : i32, i32
  }
  func.func @transform_3(%arg0: i32) -> (i32, i32) {
    %c0_i32 = arith.constant 0 : i32
    %c0_i32_0 = arith.constant 0 : i32
    return %arg0, %c0_i32 : i32, i32
  }
}

</mosaic_0001>

<bundles_post_ra>
// kernel: tpu_custom_call.1
= control target key start
LH: loop header
LB: loop body
LE: loop exit
PB: predicated region body
PF: predicated region fallthrough
CT: control target
= control target key end

     0   :  { %8 = vsyncpa [#allocation3], 0  ;;  %s4225_s0 = inlined_call_operand.hbm [shape: f32[256,128], index: 0, kind: input, shape index: {}]   ;;  %s4226_s1 = inlined_call_operand.hbm [shape: f32[128,128], index: 1, kind: input, shape index: {}]   ;;  %s4227_s2 = inlined_call_operand.vmem [shape: f32[1,128], index: 2, kind: input, shape index: {}]   ;;  %s4228_s3 = inlined_call_operand.hbm [shape: f32[256,128], index: 3, kind: output, shape index: {}]  }
   0x1   :  { %9 = vsyncpa [#allocation6], 0 }
   0x2   :  { %10 = vsyncpa [#allocation4], 0  ;;  %s3126_s12 = smov [#allocation2]  }
   0x3   :  { %s16_s13 = sshll.u32 %s3126_s12, 4  ;;  %s17_s13 = int_to_ptr.vmem [resolvable:$true] %s16_s13 }
   0x4   :  { %s3068_s14 = scalar_lea.vmem %s17_s13, 4096  ;;  %p3073_p1 = scmp.lt.s32.totalorder %s17_s13, %s17_s13 }
   0x5   :  { %p3069_p0 = scmp.ne.s32.totalorder %s17_s13, %s3068_s14  ;;  %p3074_p2 = scmp.lt.s32.totalorder %s3068_s14, %s3068_s14 }
   0x7   :  { %p3075_p3 = por %p3074_p2, %p3073_p1 }
   0x9   :  { %p3076_p4 = pnand %p3075_p3, %p3069_p0 }
   0xb   :  { %3079 = shalt.err (!%p3076_p4)
}
   0xc   :  { %s3127_s15 = smov 128   ;;  %s3128_s16 = smov 8  }
   0xd   :  { %22 = dma.hbm_to_vmem [thread:$0]  %s4225_s0, 4096, %s17_s13, [#allocation3], %s3127_s15, %s3127_s15, %s3128_s16  }
   0xe   :  { %s3129_s19 = smov [#allocation5]  }
   0xf   :  { %s28_s20 = sshll.u32 %s3129_s19, 4  ;;  %s29_s20 = int_to_ptr.vmem [resolvable:$true] %s28_s20 }
  0x10   :  { %s3088_s21 = scalar_lea.vmem %s29_s20, 2048  ;;  %p3093_p6 = scmp.lt.s32.totalorder %s29_s20, %s29_s20 }
  0x11   :  { %p3089_p5 = scmp.ne.s32.totalorder %s29_s20, %s3088_s21  ;;  %p3094_p7 = scmp.lt.s32.totalorder %s3088_s21, %s3088_s21 }
  0x13   :  { %p3095_p8 = por %p3094_p7, %p3093_p6 }
  0x15   :  { %p3096_p9 = pnand %p3095_p8, %p3089_p5 }
  0x17   :  { %3099 = shalt.err (!%p3096_p9)
}
  0x18   :  { %34 = dma.hbm_to_vmem [thread:$0]  %s4226_s1, 2048, %s29_s20, [#allocation6], %s3127_s15, %s3127_s15, %s3128_s16  }
  0x19   :  { %3120 = dma.done.wait [#allocation3], 4096  }
  0x1a   :  { %3121 = vsyncadd [#allocation3], 4294963200 }
  0x1b   :  { %3122 = dma.done.wait [#allocation6], 2048  }
  0x1c   :  { %3123 = vsyncadd [#allocation6], 4294965248  ;;  %v90_v0 = vld [vmem:[#allocation5 + $0x78] sm:$0xff]  ;;  %v89_v1 = vld [vmem:[#allocation5 + $0x70] sm:$0xff] }
  0x1d   :  { %v88_v2 = vld [vmem:[#allocation5 + $0x68] sm:$0xff]  ;;  %v3164_v3 = vand.u32 4294901760, %v90_v0  ;;  %v3166_v4 = vand.u32 4294901760, %v89_v1  ;;  %v87_v6 = vld [vmem:[#allocation5 + $0x60] sm:$0xff]  ;;  %v86_v7 = vld [vmem:[#allocation5 + $0x58] sm:$0xff] }
  0x1e   :  { %v3168_v5 = vand.u32 4294901760, %v88_v2  ;;  %v85_v8 = vld [vmem:[#allocation5 + $0x50] sm:$0xff]  ;;  %v3170_v9 = vand.u32 4294901760, %v87_v6  ;;  %v3172_v10 = vand.u32 4294901760, %v86_v7  ;;  %v84_v12 = vld [vmem:[#allocation5 + $0x48] sm:$0xff]  ;;  %v83_v13 = vld [vmem:[#allocation5 + $0x40] sm:$0xff] }
  0x1f   :  { %v3174_v11 = vand.u32 4294901760, %v85_v8  ;;  %2574 = vmatprep.subr.mxu0 %v3164_v3  ;;  %v3178_v14 = vsub.f32 %v90_v0, %v3164_v3  ;;  %v3181_v15 = vsub.f32 %v89_v1, %v3166_v4  ;;  %v3183_v16 = vand.u32 4294901760, %v84_v12  ;;  %v82_v18 = vld [vmem:[#allocation5 + $0x38] sm:$0xff]  ;;  %v81_v25 = vld [vmem:[#allocation5 + $0x30] sm:$0xff]  ;;  %v80_v35 = vld [vmem:[#allocation5 + $0x28] sm:$0xff] }
  0x20   :  { %v3186_v17 = vsub.f32 %v88_v2, %v3168_v5  ;;  %2575 = vmatpush3.msra.mxu0 %v3164_v3  ;;  %v3190_v19 = vsub.f32 %v87_v6, %v3170_v9  ;;  %v3193_v20 = vsub.f32 %v86_v7, %v3172_v10  ;;  %v3205_v24 = vand.u32 4294901760, %v83_v13  ;;  %v79_v40 = vld [vmem:[#allocation5 + $0x20] sm:$0xff]  ;;  %v44_v49 = vld [vmem:[#allocation2 + $0x8] sm:$0xff]  ;;  %v78_v53 = vld [vmem:[#allocation5 + $0x18] sm:$0xff] }
  0x21   :  { %2576 = vmatprep.subr.mxu0 %v3166_v4  ;;  %v3197_v21 = vand.u32 4294901760, %v3178_v14  ;;  %v3200_v22 = vand.u32 4294901760, %v3181_v15  ;;  %v3211_v27 = vand.u32 4294901760, %v82_v18  ;;  %v3217_v29 = vsub.f32 %v85_v8, %v3174_v11  ;;  %v43_v47 = vld [vmem:[#allocation2] sm:$0xff]  ;;  %v77_v59 = vld [vmem:[#allocation5 + $0x10] sm:$0xff]  ;;  %v76_v6 = vld [vmem:[#allocation5 + $0x8] sm:$0xff] }
  0x22   :  { %v3203_v23 = vand.u32 4294901760, %v3186_v17  ;;  %2577 = vmatpush3.msra.mxu0 %v3166_v4  ;;  %v3209_v26 = vand.u32 4294901760, %v3190_v19  ;;  %v3214_v28 = vand.u32 4294901760, %v3193_v20  ;;  %v3227_v33 = vsub.f32 %v84_v12, %v3183_v16  ;;  %v45_v63 = vld [vmem:[#allocation2 + $0x10] sm:$0xff]  ;;  %v46_v8 = vld [vmem:[#allocation2 + $0x18] sm:$0xff] }
  0x23   :  { %4331 = vst [vmem:[#allocation11_spill] sm:$0xff] %v3197_v21  ;;  %4332 = vst [vmem:[#allocation12_spill] sm:$0xff] %v3200_v22  ;;  %2578 = vmatprep.subr.mxu0 %v3168_v5  ;;  %v503_v30 = vsub.f32 %v3178_v14, %v3197_v21  ;;  %v510_v31 = vsub.f32 %v3181_v15, %v3200_v22  ;;  %v3230_v34 = vand.u32 4294901760, %v81_v25  ;;  %v3236_v39 = vand.u32 4294901760, %v3217_v29  ;;  %v52_v21 = vld [vmem:[#allocation2 + $0x48] sm:$0xff] }
  0x24   :  { %4333 = vst [vmem:[#allocation13_spill] sm:$0xff] %v3203_v23  ;;  %4334 = vst [vmem:[#allocation14_spill] sm:$0xff] %v3209_v26  ;;  %v517_v32 = vsub.f32 %v3186_v17, %v3203_v23  ;;  %2579 = vmatpush3.msra.mxu0 %v3168_v5  ;;  %v524_v38 = vsub.f32 %v3190_v19, %v3209_v26  ;;  %v3240_v41 = vand.u32 4294901760, %v3227_v33  ;;  %v3248_v45 = vand.u32 4294901760, %v80_v35 }
  0x25   :  { %4335 = vst [vmem:[#allocation15_spill] sm:$0xff] %v3214_v28  ;;  %2580 = vmatprep.subr.mxu0 %v3170_v9  ;;  %v504_v36 = vand.u32 4294901760, %v503_v30  ;;  %v511_v37 = vand.u32 4294901760, %v510_v31  ;;  %4336 = vst [vmem:[#allocation16_spill] sm:$0xff] %v3236_v39  ;;  %v3243_v42 = vsub.f32 %v83_v13, %v3205_v24  ;;  %v531_v44 = vsub.f32 %v3193_v20, %v3214_v28  ;;  %v75_v31 = vld [vmem:[#allocation5] sm:$0xff] }
  0x26   :  { %2581 = vmatpush3.msra.mxu0 %v3170_v9  ;;  %4337 = vst [vmem:[#allocation17_spill] sm:$0xff] %v3240_v41  ;;  %v518_v43 = vand.u32 4294901760, %v517_v32  ;;  %v3251_v46 = vsub.f32 %v82_v18, %v3211_v27  ;;  %v3254_v48 = vand.u32 4294901760, %v79_v40  ;;  %v525_v50 = vand.u32 4294901760, %v524_v38 }
  0x27   :  { %2582 = vmatprep.subr.mxu0 %v3172_v10  ;;  %2654 = vmatprep.subr.mxu1 %v504_v36  ;;  %v538_v51 = vsub.f32 %v3217_v29, %v3236_v39  ;;  %v3260_v52 = vand.u32 4294901760, %v3243_v42  ;;  %v3263_v54 = vsub.f32 %v81_v25, %v3230_v34  ;;  %v545_v55 = vsub.f32 %v3227_v33, %v3240_v41 }
  0x28   :  { %2583 = vmatpush3.msra.mxu0 %v3172_v10  ;;  %2655 = vmatpush3.msra.mxu1 %v504_v36  ;;  %v3268_v56 = vand.u32 4294901760, %v43_v47  ;;  %v532_v57 = vand.u32 4294901760, %v531_v44  ;;  %v3272_v58 = vand.u32 4294901760, %v3251_v46  ;;  %v3275_v60 = vsub.f32 %v80_v35, %v3248_v45 }
  0x29   :  { %2584 = vmatprep.subr.mxu0 %v3174_v11  ;;  %2656 = vmatprep.subr.mxu1 %v511_v37  ;;  %4338 = vst [vmem:[#allocation18_spill] sm:$0xff] %v3260_v52  ;;  %v3277_v61 = vand.u32 4294901760, %v44_v49  ;;  %v3280_v62 = vand.u32 4294901760, %v78_v53  ;;  %v539_v0 = vand.u32 4294901760, %v538_v51  ;;  %v552_v1 = vsub.f32 %v3243_v42, %v3260_v52 }
  0x2a   :  { %2585 = vmatpush3.msra.mxu0 %v3174_v11  ;;  %2657 = vmatpush3.msra.mxu1 %v511_v37  ;;  %4339 = vst [vmem:[#allocation19_spill] sm:$0xff] %v3268_v56  ;;  %4340 = vst [vmem:[#allocation20_spill] sm:$0xff] %v3272_v58  ;;  %v3286_v2 = vand.u32 4294901760, %v3263_v54  ;;  %v3289_v7 = vsub.f32 %v79_v40, %v3254_v48  ;;  %v546_v12 = vand.u32 4294901760, %v545_v55  ;;  %v3292_v13 = vand.u32 4294901760, %v77_v59  ;;  %v47_v40 = vld [vmem:[#allocation2 + $0x20] sm:$0xff] }
  0x2b   :  { %2586 = vmatprep.subr.mxu0 %v3183_v16  ;;  %2658 = vmatprep.subr.mxu1 %v518_v43  ;;  %4341 = vst [vmem:[#allocation21_spill] sm:$0xff] %v3277_v61  ;;  %4342 = vst [vmem:[#allocation22_spill] sm:$0xff] %v3280_v62  ;;  %v3295_v18 = vsub.f32 %v43_v47, %v3268_v56  ;;  %v559_v25 = vsub.f32 %v3251_v46, %v3272_v58  ;;  %v3301_v30 = vand.u32 4294901760, %v3275_v60 }
  0x2c   :  { %2587 = vmatpush3.msra.mxu0 %v3183_v16  ;;  %2659 = vmatpush3.msra.mxu1 %v518_v43  ;;  %4343 = vst [vmem:[#allocation23_spill] sm:$0xff] %v3286_v2  ;;  %4344 = vst [vmem:[#allocation24_spill] sm:$0xff] %v3292_v13  ;;  %v3304_v32 = vsub.f32 %v44_v49, %v3277_v61  ;;  %v3306_v35 = vand.u32 4294901760, %v45_v63  ;;  %v3309_v36 = vand.u32 4294901760, %v76_v6  ;;  %v3314_v38 = vand.u32 4294901760, %v46_v8 }
  0x2d   :  { %2588 = vmatprep.subr.mxu0 %v3205_v24  ;;  %2660 = vmatprep.subr.mxu1 %v525_v50  ;;  %4345 = vst [vmem:[#allocation25_spill] sm:$0xff] %v3295_v18  ;;  %4346 = vst [vmem:[#allocation26_spill] sm:$0xff] %v3301_v30  ;;  %v3312_v37 = vsub.f32 %v78_v53, %v3280_v62  ;;  %v553_v43 = vand.u32 4294901760, %v552_v1  ;;  %v566_v44 = vsub.f32 %v3263_v54, %v3286_v2  ;;  %v49_v1 = vld [vmem:[#allocation2 + $0x30] sm:$0xff] }
  0x2e   :  { %2589 = vmatpush3.msra.mxu0 %v3205_v24  ;;  %2661 = vmatpush3.msra.mxu1 %v525_v50  ;;  %4347 = vst [vmem:[#allocation27_spill] sm:$0xff] %v3304_v32  ;;  %4348 = vst [vmem:[#allocation28_spill] sm:$0xff] %v3306_v35  ;;  %v3320_v47 = vand.u32 4294901760, %v3289_v7  ;;  %v3323_v49 = vsub.f32 %v45_v63, %v3306_v35  ;;  %v48_v50 = vld [vmem:[#allocation2 + $0x28] sm:$0xff]  ;;  %v3326_v51 = vand.u32 4294901760, %v75_v31  ;;  %v560_v63 = vand.u32 4294901760, %v559_v25 }
  0x2f   :  { %2590 = vmatprep.subr.mxu0 %v3211_v27  ;;  %2662 = vmatprep.subr.mxu1 %v532_v57  ;;  %4349 = vst [vmem:[#allocation29_spill] sm:$0xff] %v3309_v36  ;;  %4350 = vst [vmem:[#allocation30_spill] sm:$0xff] %v3314_v38  ;;  %v3330_v55 = vsub.f32 %v77_v59, %v3292_v13  ;;  %v573_v2 = vsub.f32 %v3275_v60, %v3301_v30  ;;  %v3339_v58 = vand.u32 4294901760, %v47_v40  ;;  %v50_v25 = vld [vmem:[#allocation2 + $0x38] sm:$0xff] }
  0x30   :  { %2591 = vmatpush3.msra.mxu0 %v3211_v27  ;;  %2663 = vmatpush3.msra.mxu1 %v532_v57  ;;  %4351 = vst [vmem:[#allocation31_spill] sm:$0xff] %v3320_v47  ;;  %4352 = vst [vmem:[#allocation32_spill] sm:$0xff] %v3323_v49  ;;  %v3333_v57 = vsub.f32 %v46_v8, %v3314_v38  ;;  %v3343_v59 = vand.u32 4294901760, %v3312_v37  ;;  %v3347_v53 = vsub.f32 %v76_v6, %v3309_v36 }
  0x31   :  { %2592 = vmatprep.subr.mxu0 %v3230_v34  ;;  %2664 = vmatprep.subr.mxu1 %v539_v0  ;;  %4353 = vst [vmem:[#allocation33_spill] sm:$0xff] %v3326_v51  ;;  %4354 = vst [vmem:[#allocation34_spill] sm:$0xff] %v3330_v55  ;;  %v3349_v52 = vand.u32 4294901760, %v48_v50  ;;  %v580_v30 = vsub.f32 %v3289_v7, %v3320_v47  ;;  %v3357_v41 = vand.u32 4294901760, %v49_v1  ;;  %v4362_v6 = vand.u32 4294901760, %v3295_v18  ;;  %v51_v47 = vld [vmem:[#allocation2 + $0x40] sm:$0xff] }
  0x32   :  { %2593 = vmatpush3.msra.mxu0 %v3230_v34  ;;  %2665 = vmatpush3.msra.mxu1 %v539_v0  ;;  %4355 = vst [vmem:[#allocation35_spill] sm:$0xff] %v3333_v57  ;;  %4356 = vst [vmem:[#allocation36_spill] sm:$0xff] %v3339_v58  ;;  %v567_v0 = vand.u32 4294901760, %v566_v44  ;;  %v3364_v39 = vand.u32 4294901760, %v3330_v55  ;;  %v3368_v28 = vsub.f32 %v75_v31, %v3326_v51  ;;  %v4364_v26 = vand.u32 4294901760, %v3304_v32 }
  0x33   :  { %2594 = vmatprep.subr.mxu0 %v3248_v45  ;;  %2666 = vmatprep.subr.mxu1 %v546_v12  ;;  %4357 = vst [vmem:[#allocation37_spill] sm:$0xff] %v3343_v59  ;;  %4358 = vst [vmem:[#allocation38_spill] sm:$0xff] %v3347_v53  ;;  %v182_v8 = vsub.f32 %v3295_v18, %v4362_v6  ;;  %v3375_v23 = vsub.f32 %v48_v50, %v3349_v52  ;;  %v3377_v6 = vand.u32 4294901760, %v50_v25 }
  0x34   :  { %2595 = vmatpush3.msra.mxu0 %v3248_v45  ;;  %2667 = vmatpush3.msra.mxu1 %v546_v12  ;;  %4359 = vst [vmem:[#allocation39_spill] sm:$0xff] %v3349_v52  ;;  %v3355_v12 = vsub.f32 %v47_v40, %v3339_v58  ;;  %4361 = vst [vmem:[#allocation41_spill] sm:$0xff] %v3357_v41  ;;  %v574_v40 = vand.u32 4294901760, %v573_v2  ;;  %v587_v31 = vsub.f32 %v3312_v37, %v3343_v59 }
  0x35   :  { %2596 = vmatprep.subr.mxu0 %v3254_v48  ;;  %2668 = vmatprep.subr.mxu1 %v553_v43  ;;  %4363 = vst [vmem:[#allocation42_spill] sm:$0xff] %v3364_v39  ;;  %4365 = vst [vmem:[#allocation43_spill] sm:$0xff] %v3377_v6  ;;  %v4366_v44 = vand.u32 4294901760, %v3323_v49  ;;  %v3386_v2 = vand.u32 4294901760, %v3347_v53  ;;  %v581_v50 = vand.u32 4294901760, %v580_v30  ;;  %v183_v59 = vand.u32 4294901760, %v182_v8 }
  0x36   :  { %4360 = vst [vmem:[#allocation40_spill] sm:$0xff] %v3355_v12  ;;  %2597 = vmatpush3.msra.mxu0 %v3254_v48  ;;  %2669 = vmatpush3.msra.mxu1 %v553_v43  ;;  %v192_v43 = vsub.f32 %v3304_v32, %v4364_v26  ;;  %v3391_v32 = vsub.f32 %v49_v1, %v3357_v41  ;;  %v3402_v18 = vand.u32 4294901760, %v3368_v28  ;;  %v53_v30 = vld [vmem:[#allocation2 + $0x50] sm:$0xff]  ;;  %v3409_v8 = vand.u32 4294901760, %v52_v21 }
  0x37   :  { %2598 = vmatprep.subr.mxu0 %v3280_v62  ;;  %2670 = vmatprep.subr.mxu1 %v560_v63  ;;  %v202_v22 = vsub.f32 %v3323_v49, %v4366_v44  ;;  %4367 = vst [vmem:[#allocation44_spill] sm:$0xff] %v3386_v2  ;;  %v594_v44 = vsub.f32 %v3330_v55, %v3364_v39  ;;  %v4369_v49 = vand.u32 4294901760, %v3333_v57  ;;  %v588_v39 = vand.u32 4294901760, %v587_v31 }
  0x38   :  { %2599 = vmatpush3.msra.mxu0 %v3280_v62  ;;  %2671 = vmatpush3.msra.mxu1 %v560_v63  ;;  %v3393_v63 = vand.u32 4294901760, %v51_v47  ;;  %4370 = vst [vmem:[#allocation46_spill] sm:$0xff] %v3402_v18  ;;  %v193_v1 = vand.u32 4294901760, %v192_v43  ;;  %4371 = vst [vmem:[#allocation47_spill] sm:$0xff] %v3409_v8  ;;  %v54_v43 = vld [vmem:[#allocation2 + $0x58] sm:$0xff] }
  0x39   :  { %2600 = vmatprep.subr.mxu0 %v3292_v13  ;;  %2672 = vmatprep.subr.mxu1 %v567_v0  ;;  %v212_v26 = vsub.f32 %v3333_v57, %v4369_v49  ;;  %v203_v49 = vand.u32 4294901760, %v202_v22  ;;  %v601_v57 = vsub.f32 %v3347_v53, %v3386_v2  ;;  %v595_v22 = vand.u32 4294901760, %v594_v44 }
  0x3a   :  { %4368 = vst [vmem:[#allocation45_spill] sm:$0xff] %v3393_v63  ;;  %2601 = vmatpush3.msra.mxu0 %v3292_v13  ;;  %2673 = vmatpush3.msra.mxu1 %v567_v0  ;;  %v3407_v0 = vsub.f32 %v50_v25, %v3377_v6  ;;  %v4372_v13 = vand.u32 4294901760, %v3355_v12  ;;  %v3420_v62 = vsub.f32 %v51_v47, %v3393_v63  ;;  %v4374_v2 = vand.u32 4294901760, %v3375_v23 }
  0x3b   :  { %2602 = vmatprep.subr.mxu0 %v3309_v36  ;;  %2674 = vmatprep.subr.mxu1 %v574_v40  ;;  %v213_v31 = vand.u32 4294901760, %v212_v26  ;;  %v3434_v53 = vand.u32 4294901760, %v54_v43 }
  0x3c   :  { %2603 = vmatpush3.msra.mxu0 %v3309_v36  ;;  %2675 = vmatpush3.msra.mxu1 %v574_v40  ;;  %v222_v55 = vsub.f32 %v3355_v12, %v4372_v13  ;;  %v3422_v36 = vand.u32 4294901760, %v53_v30  ;;  %v55_v40 = vld [vmem:[#allocation2 + $0x60] sm:$0xff]  ;;  %v608_v13 = vsub.f32 %v3368_v28, %v3402_v18  ;;  %v232_v25 = vsub.f32 %v3375_v23, %v4374_v2 }
  0x3d   :  { %2604 = vmatprep.subr.mxu0 %v3326_v51  ;;  %2676 = vmatprep.subr.mxu1 %v581_v50  ;;  %v3432_v12 = vsub.f32 %v52_v21, %v3409_v8  ;;  %4375 = vst [vmem:[#allocation49_spill] sm:$0xff] %v3434_v53  ;;  %v3436_v44 = vand.u32 4294901760, %v55_v40 }
  0x3e   :  { %4373 = vst [vmem:[#allocation48_spill] sm:$0xff] %v3422_v36  ;;  %2605 = vmatpush3.msra.mxu0 %v3326_v51  ;;  %2606 = vmatprep.mubr.f32.mxu0 %v183_v59  ;;  %v56_v51 = vld [vmem:[#allocation2 + $0x68] sm:$0xff]  ;;  %v602_v59 = vand.u32 4294901760, %v601_v57  ;;  %v223_v26 = vand.u32 4294901760, %v222_v55  ;;  %v3444_v21 = vsub.f32 %v53_v30, %v3422_v36  ;;  %v609_v47 = vand.u32 4294901760, %v608_v13  ;;  %v57_v55 = vld [vmem:[#allocation2 + $0x70] sm:$0xff] }
  0x3f   :  { %2677 = vmatpush3.msra.mxu1 %v581_v50  ;;  %2607 = vmatmul.mubr.f32.vlgmr.msra.gmra.mxu0 %v193_v1  ;;  %4376 = vst [vmem:[#allocation50_spill] sm:$0xff] %v3436_v44  ;;  %v4377_v50 = vand.u32 4294901760, %v3391_v32  ;;  %v3447_v57 = vand.u32 4294901760, %v56_v51  ;;  %v3454_v1 = vsub.f32 %v54_v43, %v3434_v53  ;;  %v3457_v30 = vsub.f32 %v55_v40, %v3436_v44  ;;  %v58_v13 = vld [vmem:[#allocation2 + $0x78] sm:$0xff]  ;;  %v59_v40 = vld [vmem:[#allocation2 + $0x80] sm:$0xff] }
  0x40   :  { %2678 = vmatprep.subr.mxu1 %v588_v39  ;;  %2609 = vmatprep.mubr.f32.mxu0 %v203_v49  ;;  %v4379_v49 = vand.u32 4294901760, %v3407_v0 }
  0x41   :  { %2679 = vmatpush3.msra.mxu1 %v588_v39  ;;  %2686 = vmatprep.mubr.f32.mxu1 %v3268_v56  ;;  %v242_v2 = vsub.f32 %v3391_v32, %v4377_v50  ;;  %4378 = vst [vmem:[#allocation51_spill] sm:$0xff] %v3447_v57  ;;  %v233_v39 = vand.u32 4294901760, %v232_v25  ;;  %4380 = vst [vmem:[#allocation52_spill] sm:$0xff] %v3454_v1  ;;  %v4382_v25 = vand.u32 4294901760, %v3420_v62  ;;  %v3464_v50 = vand.u32 4294901760, %v57_v55 }
  0x42   :  { %2680 = vmatprep.subr.mxu1 %v595_v22  ;;  %2734 = vmatprep.subr.mxu0 %v3178_v14  ;;  %v252_v56 = vsub.f32 %v3407_v0, %v4379_v49  ;;  %4381 = vst [vmem:[#allocation53_spill] sm:$0xff] %v3457_v30  ;;  %v3468_v43 = vsub.f32 %v56_v51, %v3447_v57  ;;  %v60_v51 = vld [vmem:[#allocation2 + $0x88] sm:$0xff]  ;;  %v4389_v49 = vand.u32 4294901760, %v3457_v30 }
  0x43   :  { %2681 = vmatpush3.msra.mxu1 %v595_v22  ;;  %2610 = vmatmul.mubr.f32.gmra.mxu0 %v213_v31  ;;  %v243_v22 = vand.u32 4294901760, %v242_v2  ;;  %v262_v31 = vsub.f32 %v3420_v62, %v4382_v25  ;;  %4383 = vst [vmem:[#allocation54_spill] sm:$0xff] %v3464_v50  ;;  %v3474_v25 = vand.u32 4294901760, %v58_v13  ;;  %v3486_v2 = vand.u32 4294901760, %v59_v40 }
  0x44   :  { %2682 = vmatprep.subr.mxu1 %v602_v59  ;;  %2612 = vmatprep.mubr.f32.mxu0 %v223_v26  ;;  %4384 = vst [vmem:[#allocation55_spill] sm:$0xff] %v3468_v43  ;;  %v3498_v18 = vand.u32 4294901760, %v60_v51 }
  0x45   :  { %2683 = vmatpush3.msra.mxu1 %v602_v59  ;;  %2735 = vmatpush3.msra.mxu0 %v3178_v14  ;;  %v253_v59 = vand.u32 4294901760, %v252_v56  ;;  %v4385_v14 = vand.u32 4294901760, %v3432_v12  ;;  %v4386_v56 = vand.u32 4294901760, %v3444_v21  ;;  %4387 = vst [vmem:[#allocation56_spill] sm:$0xff] %v3486_v2 }
  0x46   :  { %2684 = vmatprep.subr.mxu1 %v609_v47  ;;  %2736 = vmatprep.subr.mxu0 %v3181_v15 }
  0x47   :  { %2685 = vmatpush3.msra.mxu1 %v609_v47  ;;  %2613 = vmatmul.mubr.f32.gmra.mxu0 %v233_v39  ;;  %v272_v26 = vsub.f32 %v3432_v12, %v4385_v14  ;;  %v263_v47 = vand.u32 4294901760, %v262_v31  ;;  %v282_v39 = vsub.f32 %v3444_v21, %v4386_v56  ;;  %v3484_v14 = vsub.f32 %v57_v55, %v3464_v50 }
  0x48   :  { %2687 = vmatmul.mubr.f32.vlgmr.msra.gmra.mxu1 %v3277_v61  ;;  %2814 = vmatprep.subr.mxu1 %v3164_v3  ;;  %v61_v61 = vld [vmem:[#allocation2 + $0x90] sm:$0xff]  ;;  %v4388_v31 = vand.u32 4294901760, %v3454_v1  ;;  %v3496_v55 = vsub.f32 %v58_v13, %v3474_v25  ;;  %v3508_v13 = vsub.f32 %v59_v40, %v3486_v2  ;;  %v3520_v40 = vsub.f32 %v60_v51, %v3498_v18 }
  0x49   :  { %2815 = vmatpush3.msra.mxu1 %v3164_v3  ;;  %2615 = vmatprep.mubr.f32.mxu0 %v243_v22  ;;  %v273_v22 = vand.u32 4294901760, %v272_v26  ;;  %v283_v26 = vand.u32 4294901760, %v282_v39 }
  0x4a   :  { %2689 = vmatprep.mubr.f32.mxu1 %v3306_v35  ;;  %2816 = vmatprep.subr.mxu1 %v3166_v4  ;;  %v292_v56 = vsub.f32 %v3454_v1, %v4388_v31  ;;  %v62_v35 = vld [vmem:[#allocation2 + $0x98] sm:$0xff]  ;;  %4390 = vst [vmem:[#allocation57_spill] sm:$0xff] %v3508_v13  ;;  %v3510_v1 = vand.u32 4294901760, %v61_v61 }
  0x4b   :  { %2616 = vmatmul.mubr.f32.gmra.mxu0 %v253_v59  ;;  %2817 = vmatpush3.msra.mxu1 %v3166_v4  ;;  %v302_v59 = vsub.f32 %v3457_v30, %v4389_v49  ;;  %v3522_v31 = vand.u32 4294901760, %v62_v35  ;;  %v64_v30 = vld [vmem:[#allocation2 + $0xa8] sm:$0xff] }
  0x4c   :  { %2690 = vmatmul.mubr.f32.gmra.mxu1 %v3314_v38  ;;  %2737 = vmatpush3.msra.mxu0 %v3181_v15  ;;  %v4391_v15 = vand.u32 4294901760, %v3468_v43  ;;  %v63_v38 = vld [vmem:[#allocation2 + $0xa0] sm:$0xff]  ;;  %v3532_v51 = vsub.f32 %v61_v61, %v3510_v1 }
  0x4d   :  { %2618 = vmatprep.mubr.f32.mxu0 %v263_v47  ;;  %2692 = vmatprep.mubr.f32.mxu1 %v3339_v58  ;;  %v293_v47 = vand.u32 4294901760, %v292_v56  ;;  %v303_v58 = vand.u32 4294901760, %v302_v59  ;;  %v3534_v39 = vand.u32 4294901760, %v63_v38  ;;  %v4394_v59 = vand.u32 4294901760, %v3496_v55 }
  0x4e   :  { %2738 = vmatprep.subr.mxu0 %v3186_v17  ;;  %2818 = vmatprep.subr.mxu1 %v3168_v5  ;;  %v312_v49 = vsub.f32 %v3468_v43, %v4391_v15  ;;  %4393 = vst [vmem:[#allocation58_spill] sm:$0xff] %v3532_v51  ;;  %v65_v43 = vld [vmem:[#allocation2 + $0xb0] sm:$0xff]  ;;  %v3544_v61 = vsub.f32 %v62_v35, %v3522_v31  ;;  %v3546_v15 = vand.u32 4294901760, %v64_v30 }
  0x4f   :  { %2619 = vmatmul.mubr.f32.gmra.mxu0 %v273_v22  ;;  %2819 = vmatpush3.msra.mxu1 %v3168_v5  ;;  %v4392_v22 = vand.u32 4294901760, %v3484_v14 }
  0x50   :  { %2693 = vmatmul.mubr.f32.gmra.mxu1 %v3349_v52  ;;  %2739 = vmatpush3.msra.mxu0 %v3186_v17  ;;  %v313_v17 = vand.u32 4294901760, %v312_v49  ;;  %v3550_v49 = vand.u32 4294901760, %v65_v43  ;;  %v3558_v52 = vsub.f32 %v63_v38, %v3534_v39  ;;  %v3570_v38 = vsub.f32 %v64_v30, %v3546_v15 }
  0x51   :  { %2621 = vmatprep.mubr.f32.mxu0 %v283_v26  ;;  %2695 = vmatprep.mubr.f32.mxu1 %v3357_v41  ;;  %v322_v56 = vsub.f32 %v3484_v14, %v4392_v22  ;;  %v332_v26 = vsub.f32 %v3496_v55, %v4394_v59  ;;  %v66_v41 = vld [vmem:[#allocation2 + $0xb8] sm:$0xff]  ;;  %v4395_v59 = vand.u32 4294901760, %v3508_v13 }
  0x52   :  { %2740 = vmatprep.subr.mxu0 %v3190_v19  ;;  %2820 = vmatprep.subr.mxu1 %v3170_v9  ;;  %4397 = vst [vmem:[#allocation59_spill] sm:$0xff] %v3570_v38 }
  0x53   :  { %2622 = vmatmul.mubr.f32.gmra.mxu0 %v293_v47  ;;  %2821 = vmatpush3.msra.mxu1 %v3170_v9  ;;  %v323_v47 = vand.u32 4294901760, %v322_v56  ;;  %v342_v22 = vsub.f32 %v3508_v13, %v4395_v59  ;;  %v4396_v56 = vand.u32 4294901760, %v3520_v40  ;;  %v4399_v13 = vand.u32 4294901760, %v3532_v51 }
  0x54   :  { %2696 = vmatmul.mubr.f32.gmra.mxu1 %v3377_v6  ;;  %2741 = vmatpush3.msra.mxu0 %v3190_v19  ;;  %v3562_v19 = vand.u32 4294901760, %v66_v41  ;;  %v67_v6 = vld [vmem:[#allocation2 + $0xc0] sm:$0xff] }
  0x55   :  { %2624 = vmatprep.mubr.f32.mxu0 %v303_v58  ;;  %2698 = vmatprep.mubr.f32.mxu1 %v3393_v63  ;;  %v333_v58 = vand.u32 4294901760, %v332_v26  ;;  %v352_v59 = vsub.f32 %v3520_v40, %v4396_v56  ;;  %v3575_v63 = vsub.f32 %v65_v43, %v3550_v49  ;;  %v343_v26 = vand.u32 4294901760, %v342_v22  ;;  %v69_v43 = vld [vmem:[#allocation2 + $0xd0] sm:$0xff] }
  0x56   :  { %2742 = vmatprep.subr.mxu0 %v3193_v20  ;;  %2822 = vmatprep.subr.mxu1 %v3172_v10  ;;  %v362_v56 = vsub.f32 %v3532_v51, %v4399_v13  ;;  %v3582_v30 = vand.u32 4294901760, %v67_v6  ;;  %v3606_v35 = vand.u32 4294901760, %v69_v43 }
  0x57   :  { %2625 = vmatmul.mubr.f32.gmra.mxu0 %v313_v17  ;;  %2823 = vmatpush3.msra.mxu1 %v3172_v10  ;;  %4398 = vst [vmem:[#allocation60_spill] sm:$0xff] %v3575_v63  ;;  %v68_v17 = vld [vmem:[#allocation2 + $0xc8] sm:$0xff]  ;;  %v353_v22 = vand.u32 4294901760, %v352_v59  ;;  %v4401_v59 = vand.u32 4294901760, %v3558_v52 }
  0x58   :  { %2699 = vmatmul.mubr.f32.gmra.mxu1 %v3409_v8  ;;  %2743 = vmatpush3.msra.mxu0 %v3193_v20  ;;  %v3587_v20 = vsub.f32 %v66_v41, %v3562_v19  ;;  %v70_v8 = vld [vmem:[#allocation2 + $0xd8] sm:$0xff]  ;;  %v71_v41 = vld [vmem:[#allocation2 + $0xe0] sm:$0xff] }
  0x59   :  { %2627 = vmatprep.mubr.f32.mxu0 %v323_v47  ;;  %2701 = vmatprep.mubr.f32.mxu1 %v3422_v36  ;;  %v4400_v47 = vand.u32 4294901760, %v3544_v61  ;;  %v3594_v36 = vand.u32 4294901760, %v68_v17  ;;  %v382_v51 = vsub.f32 %v3558_v52, %v4401_v59 }
  0x5a   :  { %2744 = vmatprep.subr.mxu0 %v3217_v29  ;;  %2824 = vmatprep.subr.mxu1 %v3174_v11 }
  0x5b   :  { %2628 = vmatmul.mubr.f32.gmra.mxu0 %v333_v58  ;;  %2825 = vmatpush3.msra.mxu1 %v3174_v11  ;;  %v372_v13 = vsub.f32 %v3544_v61, %v4400_v47  ;;  %v363_v58 = vand.u32 4294901760, %v362_v56  ;;  %v3604_v47 = vsub.f32 %v67_v6, %v3582_v30  ;;  %v4402_v56 = vand.u32 4294901760, %v3570_v38 }
  0x5c   :  { %2702 = vmatmul.mubr.f32.gmra.mxu1 %v3434_v53  ;;  %2745 = vmatpush3.msra.mxu0 %v3217_v29  ;;  %v3616_v6 = vsub.f32 %v68_v17, %v3594_v36  ;;  %v4403_v29 = vand.u32 4294901760, %v3575_v63  ;;  %v72_v53 = vld [vmem:[#allocation2 + $0xe8] sm:$0xff]  ;;  %v3628_v17 = vsub.f32 %v69_v43, %v3606_v35 }
  0x5d   :  { %2630 = vmatprep.mubr.f32.mxu0 %v343_v26  ;;  %2704 = vmatprep.mubr.f32.mxu1 %v3436_v44  ;;  %v373_v26 = vand.u32 4294901760, %v372_v13  ;;  %v392_v59 = vsub.f32 %v3570_v38, %v4402_v56  ;;  %v3618_v44 = vand.u32 4294901760, %v70_v8  ;;  %v383_v13 = vand.u32 4294901760, %v382_v51 }
  0x5e   :  { %2746 = vmatprep.subr.mxu0 %v3227_v33  ;;  %2826 = vmatprep.subr.mxu1 %v3183_v16  ;;  %v3630_v38 = vand.u32 4294901760, %v71_v41  ;;  %v3642_v56 = vand.u32 4294901760, %v72_v53 }
  0x5f   :  { %2631 = vmatmul.mubr.f32.gmra.mxu0 %v353_v22  ;;  %2827 = vmatpush3.msra.mxu1 %v3183_v16  ;;  %v402_v22 = vsub.f32 %v3575_v63, %v4403_v29  ;;  %v393_v51 = vand.u32 4294901760, %v392_v59  ;;  %v3640_v43 = vsub.f32 %v70_v8, %v3618_v44  ;;  %v74_v63 = vld [vmem:[#allocation2 + $0xf8] sm:$0xff] }
  0x60   :  { %2705 = vmatmul.mubr.f32.gmra.mxu1 %v3447_v57  ;;  %2747 = vmatpush3.msra.mxu0 %v3227_v33  ;;  %v4404_v33 = vand.u32 4294901760, %v3587_v20  ;;  %v73_v57 = vld [vmem:[#allocation2 + $0xf0] sm:$0xff]  ;;  %v3652_v8 = vsub.f32 %v71_v41, %v3630_v38  ;;  %v3666_v41 = vand.u32 4294901760, %v74_v63 }
  0x61   :  { %2633 = vmatprep.mubr.f32.mxu0 %v363_v58  ;;  %2707 = vmatprep.mubr.f32.mxu1 %v3464_v50  ;;  %v403_v50 = vand.u32 4294901760, %v402_v22  ;;  %v3654_v58 = vand.u32 4294901760, %v73_v57  ;;  %v4406_v22 = vand.u32 4294901760, %v3616_v6 }
  0x62   :  { %2748 = vmatprep.subr.mxu0 %v3243_v42  ;;  %2828 = vmatprep.subr.mxu1 %v3205_v24  ;;  %v412_v29 = vsub.f32 %v3587_v20, %v4404_v33  ;;  %v3664_v33 = vsub.f32 %v72_v53, %v3642_v56  ;;  %v4408_v53 = vand.u32 4294901760, %v3640_v43 }
  0x63   :  { %2634 = vmatmul.mubr.f32.gmra.mxu0 %v373_v26  ;;  %2829 = vmatpush3.msra.mxu1 %v3205_v24  ;;  %v4405_v26 = vand.u32 4294901760, %v3604_v47 }
  0x64   :  { %2708 = vmatmul.mubr.f32.gmra.mxu1 %v3474_v25  ;;  %2749 = vmatpush3.msra.mxu0 %v3243_v42  ;;  %v413_v42 = vand.u32 4294901760, %v412_v29 }
  0x65   :  { %2636 = vmatprep.mubr.f32.mxu0 %v383_v13  ;;  %2710 = vmatprep.mubr.f32.mxu1 %v3486_v2  ;;  %v422_v59 = vsub.f32 %v3604_v47, %v4405_v26  ;;  %v432_v13 = vsub.f32 %v3616_v6, %v4406_v22  ;;  %v461_v22 = vand.u32 4294901760, %v3652_v8  ;;  %v3676_v26 = vsub.f32 %v73_v57, %v3654_v58 }
  0x66   :  { %2750 = vmatprep.subr.mxu0 %v3251_v46  ;;  %2830 = vmatprep.subr.mxu1 %v3211_v27 }
  0x67   :  { %2637 = vmatmul.mubr.f32.gmra.mxu0 %v393_v51  ;;  %2831 = vmatpush3.msra.mxu1 %v3211_v27  ;;  %v423_v29 = vand.u32 4294901760, %v422_v59  ;;  %v4407_v51 = vand.u32 4294901760, %v3628_v17  ;;  %v471_v59 = vand.u32 4294901760, %v3664_v33 }
  0x68   :  { %2711 = vmatmul.mubr.f32.gmra.mxu1 %v3498_v18  ;;  %2751 = vmatpush3.msra.mxu0 %v3251_v46  ;;  %v433_v46 = vand.u32 4294901760, %v432_v13  ;;  %v4330_v13 = vand.u32 4294901760, %v3676_v26 }
  0x69   :  { %2639 = vmatprep.mubr.f32.mxu0 %v403_v50  ;;  %2713 = vmatprep.mubr.f32.mxu1 %v3510_v1  ;;  %v442_v2 = vsub.f32 %v3628_v17, %v4407_v51  ;;  %v452_v50 = vsub.f32 %v3640_v43, %v4408_v53  ;;  %v3686_v51 = vsub.f32 %v74_v63, %v3666_v41 }
  0x6a   :  { %2752 = vmatprep.subr.mxu0 %v3263_v54  ;;  %2832 = vmatprep.subr.mxu1 %v3230_v34 }
  0x6b   :  { %2640 = vmatmul.mubr.f32.gmra.mxu0 %v413_v42  ;;  %2833 = vmatpush3.msra.mxu1 %v3230_v34  ;;  %v443_v57 = vand.u32 4294901760, %v442_v2  ;;  %v462_v42 = vsub.f32 %v3652_v8, %v461_v22  ;;  %v453_v63 = vand.u32 4294901760, %v452_v50  ;;  %v4329_v2 = vand.u32 4294901760, %v3686_v51 }
  0x6c   :  { %2714 = vmatmul.mubr.f32.gmra.mxu1 %v3522_v31  ;;  %2753 = vmatpush3.msra.mxu0 %v3263_v54  ;;  %v472_v54 = vsub.f32 %v3664_v33, %v471_v59 }
  0x6d   :  { %2642 = vmatprep.mubr.f32.mxu0 %v423_v29  ;;  %2716 = vmatprep.mubr.f32.mxu1 %v3534_v39  ;;  %v463_v29 = vand.u32 4294901760, %v462_v42 }
  0x6e   :  { %2754 = vmatprep.subr.mxu0 %v3275_v60  ;;  %2834 = vmatprep.subr.mxu1 %v3248_v45  ;;  %v473_v53 = vand.u32 4294901760, %v472_v54  ;;  %v4412_v54 = vld [vmem:[#allocation24_spill] sm:$0xff] }
  0x6f   :  { %2643 = vmatmul.mubr.f32.gmra.mxu0 %v433_v46  ;;  %2835 = vmatpush3.msra.mxu1 %v3248_v45  ;;  %v482_v46 = vsub.f32 %v3676_v26, %v4330_v13  ;;  %v4424_v13 = vld [vmem:[#allocation12_spill] sm:$0xff] }
  0x70   :  { %2717 = vmatmul.mubr.f32.gmra.mxu1 %v3546_v15  ;;  %2755 = vmatpush3.msra.mxu0 %v3275_v60  ;;  %v492_v60 = vsub.f32 %v3686_v51, %v4329_v2 }
  0x71   :  { %2645 = vmatprep.mubr.f32.mxu0 %v443_v57  ;;  %2719 = vmatprep.mubr.f32.mxu1 %v3550_v49  ;;  %v483_v50 = vand.u32 4294901760, %v482_v46  ;;  %v4409_v57 = vld [vmem:[#allocation22_spill] sm:$0xff]  ;;  %v4415_v46 = vld [vmem:[#allocation29_spill] sm:$0xff] }
  0x72   :  { %2756 = vmatprep.subr.mxu0 %v3289_v7  ;;  %2836 = vmatprep.subr.mxu1 %v3254_v48  ;;  %v493_v42 = vand.u32 4294901760, %v492_v60  ;;  %v4417_v60 = vld [vmem:[#allocation33_spill] sm:$0xff] }
  0x73   :  { %2646 = vmatmul.mubr.f32.gmra.mxu0 %v453_v63  ;;  %2837 = vmatpush3.msra.mxu1 %v3254_v48  ;;  %v4410_v63 = vld [vmem:[#allocation34_spill] sm:$0xff] }
  0x74   :  { %2720 = vmatmul.mubr.f32.gmra.mxu1 %v3562_v19  ;;  %2757 = vmatpush3.msra.mxu0 %v3289_v7  ;;  %v4411_v7 = vld [vmem:[#allocation38_spill] sm:$0xff] }
  0x75   :  { %2648 = vmatprep.mubr.f32.mxu0 %v463_v29  ;;  %2722 = vmatprep.mubr.f32.mxu1 %v3582_v30  ;;  %v4414_v29 = vld [vmem:[#allocation27_spill] sm:$0xff] }
  0x76   :  { %2758 = vmatprep.subr.mxu0 %v3312_v37  ;;  %2838 = vmatprep.subr.mxu1 %v4409_v57 }
  0x77   :  { %2649 = vmatmul.mubr.f32.gmra.mxu0 %v473_v53  ;;  %2839 = vmatpush3.msra.mxu1 %v4409_v57  ;;  %v4416_v53 = vld [vmem:[#allocation32_spill] sm:$0xff] }
  0x78   :  { %2723 = vmatmul.mubr.f32.gmra.mxu1 %v3594_v36  ;;  %2759 = vmatpush3.msra.mxu0 %v3312_v37  ;;  %v4413_v37 = vld [vmem:[#allocation25_spill] sm:$0xff]  ;;  %v4423_v2 = vand.u32 4294901760, %v4416_v53 }
  0x79   :  { %2760 = vmatprep.subr.mxu0 %v4410_v63  ;;  %2651 = vmatprep.mubr.f32.mxu0 %v483_v50  ;;  %v4418_v50 = vld [vmem:[#allocation11_spill] sm:$0xff] }
  0x7a   :  { %2725 = vmatprep.mubr.f32.mxu1 %v3606_v35  ;;  %2761 = vmatpush3.msra.mxu0 %v4410_v63  ;;  %v4421_v63 = vand.u32 4294901760, %v4413_v37 }
  0x7b   :  { %2652 = vmatmul.mubr.f32.gmra.mxu0 %v493_v42  ;;  %2762 = vmatprep.subr.mxu0 %v4411_v7  ;;  %v4420_v42 = vld [vmem:[#allocation40_spill] sm:$0xff] }
  0x7c   :  { %2726 = vmatmul.mubr.f32.gmra.mxu1 %v3618_v44  ;;  %2840 = vmatprep.subr.mxu1 %v4412_v54 }
  0x7d   :  { %2763 = vmatpush3.msra.mxu0 %v4411_v7  ;;  %2841 = vmatpush3.msra.mxu1 %v4412_v54  ;;  %v4422_v7 = vand.u32 4294901760, %v4414_v29 }
  0x7e   :  { %2764 = vmatprep.subr.mxu0 %v3368_v28  ;;  %2728 = vmatprep.mubr.f32.mxu1 %v3630_v38 }
  0x7f   :  { %2765 = vmatpush3.msra.mxu0 %v3368_v28  ;;  %2766 = vmatprep.mubr.f32.mxu0 %v4413_v37  ;;  %v4419_v28 = vld [vmem:[#allocation35_spill] sm:$0xff] }
  0x80   :  { %2729 = vmatmul.mubr.f32.gmra.mxu1 %v3642_v56  ;;  %2767 = vmatmul.mubr.f32.vlgmr.msra.gmra.mxu0 %v4414_v29  ;;  %v4425_v37 = vand.u32 4294901760, %v4419_v28  ;;  %v4427_v29 = vld [vmem:[#allocation13_spill] sm:$0xff] }
  0x81   :  { %2842 = vmatprep.subr.mxu1 %v4415_v46  ;;  %2731 = vmatprep.mubr.f32.mxu1 %v3654_v58 }
  0x82   :  { %2843 = vmatpush3.msra.mxu1 %v4415_v46  ;;  %2769 = vmatprep.mubr.f32.mxu0 %v4416_v53  ;;  %v4431_v53 = vld [vmem:[#allocation52_spill] sm:$0xff] }
  0x83   :  { %2844 = vmatprep.subr.mxu1 %v4417_v60  ;;  %2894 = vmatprep.subr.mxu0 %v4418_v50 }
  0x84   :  { %2732 = vmatmul.mubr.f32.gmra.mxu1 %v3666_v41  ;;  %2770 = vmatmul.mubr.f32.gmra.mxu0 %v4419_v28  ;;  %v4436_v28 = vld [vmem:[#allocation55_spill] sm:$0xff] }
  0x85   :  { %2845 = vmatpush3.msra.mxu1 %v4417_v60  ;;  %2772 = vmatprep.mubr.f32.mxu0 %v4420_v42 }
  0x86   :  { %2846 = vmatprep.mubr.f32.mxu1 %v4421_v63  ;;  %2974 = vmatprep.subr.mxu1 %v3164_v3  ;;  %v4444_v63 = vand.u32 4294901760, %v4436_v28 }
  0x87   :  { %2895 = vmatpush3.msra.mxu0 %v4418_v50  ;;  %v4432_v50 = vand.u32 4294901760, %v3407_v0 }
  0x88   :  { %2773 = vmatmul.mubr.f32.gmra.mxu0 %v3375_v23  ;;  %2847 = vmatmul.mubr.f32.vlgmr.msra.gmra.mxu1 %v4422_v7  ;;  %v4445_v7 = vld [vmem:[#allocation58_spill] sm:$0xff] }
  0x89   :  { %2975 = vmatpush3.msra.mxu1 %v3164_v3  ;;  %2775 = vmatprep.mubr.f32.mxu0 %v3391_v32  ;;  %v4426_v3 = vand.u32 4294901760, %v4420_v42  ;;  %v4437_v42 = vand.u32 4294901760, %v3432_v12 }
  0x8a   :  { %2849 = vmatprep.mubr.f32.mxu1 %v4423_v2  ;;  %2896 = vmatprep.subr.mxu0 %v4424_v13  ;;  %v4430_v2 = vld [vmem:[#allocation14_spill] sm:$0xff] }
  0x8b   :  { %2976 = vmatprep.subr.mxu1 %v3166_v4  ;;  %2897 = vmatpush3.msra.mxu0 %v4424_v13  ;;  %v4428_v13 = vand.u32 4294901760, %v3375_v23  ;;  %v4433_v23 = vld [vmem:[#allocation53_spill] sm:$0xff] }
  0x8c   :  { %2776 = vmatmul.mubr.f32.gmra.mxu0 %v3407_v0  ;;  %2850 = vmatmul.mubr.f32.gmra.mxu1 %v4425_v37  ;;  %v4440_v0 = vand.u32 4294901760, %v4431_v53  ;;  %v4447_v37 = vld [vmem:[#allocation18_spill] sm:$0xff] }
  0x8d   :  { %2977 = vmatpush3.msra.mxu1 %v3166_v4  ;;  %2778 = vmatprep.mubr.f32.mxu0 %v3420_v62  ;;  %v4429_v4 = vand.u32 4294901760, %v3391_v32  ;;  %v4435_v32 = vld [vmem:[#allocation15_spill] sm:$0xff] }
  0x8e   :  { %2852 = vmatprep.mubr.f32.mxu1 %v4426_v3  ;;  %2898 = vmatprep.subr.mxu0 %v4427_v29  ;;  %v4448_v3 = vand.u32 4294901760, %v3496_v55 }
  0x8f   :  { %2978 = vmatprep.subr.mxu1 %v3168_v5  ;;  %2899 = vmatpush3.msra.mxu0 %v4427_v29  ;;  %v4451_v29 = vld [vmem:[#allocation59_spill] sm:$0xff] }
  0x90   :  { %2779 = vmatmul.mubr.f32.gmra.mxu0 %v3432_v12  ;;  %2853 = vmatmul.mubr.f32.gmra.mxu1 %v4428_v13  ;;  %v4441_v12 = vld [vmem:[#allocation57_spill] sm:$0xff]  ;;  %v4452_v13 = vand.u32 4294901760, %v3520_v40 }
  0x91   :  { %2979 = vmatpush3.msra.mxu1 %v3168_v5  ;;  %2781 = vmatprep.mubr.f32.mxu0 %v3444_v21  ;;  %v4434_v5 = vand.u32 4294901760, %v3420_v62  ;;  %v4439_v62 = vld [vmem:[#allocation16_spill] sm:$0xff] }
  0x92   :  { %2855 = vmatprep.mubr.f32.mxu1 %v4429_v4  ;;  %2900 = vmatprep.subr.mxu0 %v4430_v2  ;;  %v4455_v4 = vld [vmem:[#allocation23_spill] sm:$0xff] }
  0x93   :  { %2980 = vmatprep.subr.mxu1 %v3170_v9  ;;  %2901 = vmatpush3.msra.mxu0 %v4430_v2  ;;  %v4456_v2 = vand.u32 4294901760, %v3544_v61 }
  0x94   :  { %2782 = vmatmul.mubr.f32.gmra.mxu0 %v4431_v53  ;;  %2856 = vmatmul.mubr.f32.gmra.mxu1 %v4432_v50  ;;  %v4459_v53 = vand.u32 4294901760, %v4451_v29  ;;  %v4464_v50 = vld [vmem:[#allocation37_spill] sm:$0xff] }
  0x95   :  { %2981 = vmatpush3.msra.mxu1 %v3170_v9  ;;  %2784 = vmatprep.mubr.f32.mxu0 %v4433_v23  ;;  %v4438_v9 = vand.u32 4294901760, %v3444_v21  ;;  %v4443_v21 = vld [vmem:[#allocation17_spill] sm:$0xff] }
  0x96   :  { %2858 = vmatprep.mubr.f32.mxu1 %v4434_v5  ;;  %2902 = vmatprep.subr.mxu0 %v4435_v32  ;;  %v4476_v5 = vld [vmem:[#allocation30_spill] sm:$0xff] }
  0x97   :  { %2982 = vmatprep.subr.mxu1 %v3172_v10  ;;  %2903 = vmatpush3.msra.mxu0 %v4435_v32  ;;  %v4483_v32 = vld [vmem:[#allocation48_spill] sm:$0xff] }
  0x98   :  { %2785 = vmatmul.mubr.f32.gmra.mxu0 %v4436_v28  ;;  %2859 = vmatmul.mubr.f32.gmra.mxu1 %v4437_v42  ;;  %v4484_v28 = vld [vmem:[#allocation49_spill] sm:$0xff]  ;;  %v4485_v42 = vld [vmem:[#allocation50_spill] sm:$0xff] }
  0x99   :  { %2983 = vmatpush3.msra.mxu1 %v3172_v10  ;;  %2787 = vmatprep.mubr.f32.mxu0 %v3484_v14  ;;  %v4442_v10 = vand.u32 4294901760, %v4433_v23  ;;  %v4465_v23 = vand.u32 4294901760, %v3616_v6 }
  0x9a   :  { %2861 = vmatprep.mubr.f32.mxu1 %v4438_v9  ;;  %2904 = vmatprep.subr.mxu0 %v4439_v62  ;;  %v4486_v9 = vld [vmem:[#allocation51_spill] sm:$0xff] }
  0x9b   :  { %2984 = vmatprep.subr.mxu1 %v3174_v11  ;;  %2905 = vmatpush3.msra.mxu0 %v4439_v62  ;;  %v4487_v62 = vld [vmem:[#allocation54_spill] sm:$0xff] }
  0x9c   :  { %2788 = vmatmul.mubr.f32.gmra.mxu0 %v3496_v55  ;;  %2862 = vmatmul.mubr.f32.gmra.mxu1 %v4440_v0  ;;  %v4453_v55 = vld [vmem:[#allocation60_spill] sm:$0xff] }
  0x9d   :  { %2985 = vmatpush3.msra.mxu1 %v3174_v11  ;;  %2790 = vmatprep.mubr.f32.mxu0 %v4441_v12  ;;  %v4446_v11 = vand.u32 4294901760, %v3484_v14  ;;  %v4450_v14 = vld [vmem:[#allocation20_spill] sm:$0xff] }
  0x9e   :  { %2864 = vmatprep.mubr.f32.mxu1 %v4442_v10  ;;  %2906 = vmatprep.subr.mxu0 %v4443_v21  ;;  %v4488_v0 = vld [vmem:[#allocation56_spill] sm:$0xff] }
  0x9f   :  { %2986 = vmatprep.subr.mxu1 %v3183_v16  ;;  %2907 = vmatpush3.msra.mxu0 %v4443_v21 }
  0xa0   :  { %2791 = vmatmul.mubr.f32.gmra.mxu0 %v3520_v40  ;;  %2865 = vmatmul.mubr.f32.gmra.mxu1 %v4444_v63  ;;  %v4458_v40 = vld [vmem:[#allocation26_spill] sm:$0xff] }
  0xa1   :  { %2987 = vmatpush3.msra.mxu1 %v3183_v16  ;;  %2793 = vmatprep.mubr.f32.mxu0 %v4445_v7  ;;  %v4449_v16 = vand.u32 4294901760, %v4441_v12 }
  0xa2   :  { %2867 = vmatprep.mubr.f32.mxu1 %v4446_v11  ;;  %2908 = vmatprep.subr.mxu0 %v4447_v37 }
  0xa3   :  { %2988 = vmatprep.subr.mxu1 %v3205_v24  ;;  %2909 = vmatpush3.msra.mxu0 %v4447_v37 }
  0xa4   :  { %2794 = vmatmul.mubr.f32.gmra.mxu0 %v3544_v61  ;;  %2868 = vmatmul.mubr.f32.gmra.mxu1 %v4448_v3  ;;  %v4462_v61 = vand.u32 4294901760, %v3587_v20 }
  0xa5   :  { %2989 = vmatpush3.msra.mxu1 %v3205_v24  ;;  %2796 = vmatprep.mubr.f32.mxu0 %v3558_v52  ;;  %v4454_v24 = vand.u32 4294901760, %v4445_v7 }
  0xa6   :  { %2870 = vmatprep.mubr.f32.mxu1 %v4449_v16  ;;  %2910 = vmatprep.subr.mxu0 %v4450_v14 }
  0xa7   :  { %2990 = vmatprep.subr.mxu1 %v3211_v27  ;;  %2911 = vmatpush3.msra.mxu0 %v4450_v14 }
  0xa8   :  { %2797 = vmatmul.mubr.f32.gmra.mxu0 %v4451_v29  ;;  %2871 = vmatmul.mubr.f32.gmra.mxu1 %v4452_v13 }
  0xa9   :  { %2991 = vmatpush3.msra.mxu1 %v3211_v27  ;;  %2799 = vmatprep.mubr.f32.mxu0 %v4453_v55  ;;  %v4457_v27 = vand.u32 4294901760, %v3558_v52  ;;  %v4461_v52 = vld [vmem:[#allocation31_spill] sm:$0xff] }
  0xaa   :  { %2873 = vmatprep.mubr.f32.mxu1 %v4454_v24  ;;  %2912 = vmatprep.subr.mxu0 %v4455_v4 }
  0xab   :  { %2992 = vmatprep.subr.mxu1 %v3230_v34  ;;  %2913 = vmatpush3.msra.mxu0 %v4455_v4 }
  0xac   :  { %2800 = vmatmul.mubr.f32.gmra.mxu0 %v3587_v20  ;;  %2874 = vmatmul.mubr.f32.gmra.mxu1 %v4456_v2  ;;  %v4466_v20 = vld [vmem:[#allocation42_spill] sm:$0xff] }
  0xad   :  { %2993 = vmatpush3.msra.mxu1 %v3230_v34  ;;  %2802 = vmatprep.mubr.f32.mxu0 %v3604_v47  ;;  %v4460_v34 = vand.u32 4294901760, %v4453_v55 }
  0xae   :  { %2876 = vmatprep.mubr.f32.mxu1 %v4457_v27  ;;  %2914 = vmatprep.subr.mxu0 %v4458_v40 }
  0xaf   :  { %2994 = vmatprep.subr.mxu1 %v3248_v45  ;;  %2915 = vmatpush3.msra.mxu0 %v4458_v40 }
  0xb0   :  { %2803 = vmatmul.mubr.f32.gmra.mxu0 %v3616_v6  ;;  %2877 = vmatmul.mubr.f32.gmra.mxu1 %v4459_v53  ;;  %v4469_v6 = vld [vmem:[#allocation44_spill] sm:$0xff] }
  0xb1   :  { %2995 = vmatpush3.msra.mxu1 %v3248_v45  ;;  %2805 = vmatprep.mubr.f32.mxu0 %v3628_v17  ;;  %v4463_v45 = vand.u32 4294901760, %v3604_v47  ;;  %v4468_v47 = vand.u32 4294901760, %v3640_v43 }
  0xb2   :  { %2879 = vmatprep.mubr.f32.mxu1 %v4460_v34  ;;  %2916 = vmatprep.subr.mxu0 %v4461_v52 }
  0xb3   :  { %2996 = vmatprep.subr.mxu1 %v3254_v48  ;;  %2917 = vmatpush3.msra.mxu0 %v4461_v52 }
  0xb4   :  { %2806 = vmatmul.mubr.f32.gmra.mxu0 %v3640_v43  ;;  %2880 = vmatmul.mubr.f32.gmra.mxu1 %v4462_v61  ;;  %v4472_v43 = vld [vmem:[#allocation21_spill] sm:$0xff] }
  0xb5   :  { %2997 = vmatpush3.msra.mxu1 %v3254_v48  ;;  %2808 = vmatprep.mubr.f32.mxu0 %v3652_v8  ;;  %v4467_v48 = vand.u32 4294901760, %v3628_v17  ;;  %v4470_v17 = vld [vmem:[#allocation46_spill] sm:$0xff]  ;;  %v4474_v8 = vld [vmem:[#allocation28_spill] sm:$0xff] }
  0xb6   :  { %2882 = vmatprep.mubr.f32.mxu1 %v4463_v45  ;;  %2918 = vmatprep.subr.mxu0 %v4464_v50 }
  0xb7   :  { %2998 = vmatprep.subr.mxu1 %v4409_v57  ;;  %2919 = vmatpush3.msra.mxu0 %v4464_v50 }
  0xb8   :  { %2809 = vmatmul.mubr.f32.gmra.mxu0 %v3664_v33  ;;  %2883 = vmatmul.mubr.f32.gmra.mxu1 %v4465_v23  ;;  %v4477_v33 = vld [vmem:[#allocation36_spill] sm:$0xff] }
  0xb9   :  { %2999 = vmatpush3.msra.mxu1 %v4409_v57  ;;  %2920 = vmatprep.subr.mxu0 %v4466_v20  ;;  %v4471_v57 = vld [vmem:[#allocation19_spill] sm:$0xff] }
  0xba   :  { %2811 = vmatprep.mubr.f32.mxu0 %v3676_v26  ;;  %2885 = vmatprep.mubr.f32.mxu1 %v4467_v48 }
  0xbb   :  { %2921 = vmatpush3.msra.mxu0 %v4466_v20  ;;  %3000 = vmatprep.subr.mxu1 %v4412_v54 }
  0xbc   :  { %2812 = vmatmul.mubr.f32.gmra.mxu0 %v3686_v51  ;;  %2886 = vmatmul.mubr.f32.gmra.mxu1 %v4468_v47 }
  0xbd   :  { %2922 = vmatprep.subr.mxu0 %v4469_v6  ;;  %3001 = vmatpush3.msra.mxu1 %v4412_v54  ;;  %v4473_v54 = vand.u32 4294901760, %v3676_v26  ;;  %v4479_v26 = vld [vmem:[#allocation41_spill] sm:$0xff] }
  0xbe   :  { %2923 = vmatpush3.msra.mxu0 %v4469_v6  ;;  %2888 = vmatprep.mubr.f32.mxu1 %v461_v22  ;;  %v4475_v22 = vand.u32 4294901760, %v3686_v51  ;;  %v4480_v51 = vld [vmem:[#allocation43_spill] sm:$0xff] }
  0xbf   :  { %2924 = vmatprep.subr.mxu0 %v4470_v17  ;;  %2926 = vmatprep.mubr.f32.mxu0 %v4471_v57 }
  0xc0   :  { %2925 = vmatpush3.msra.mxu0 %v4470_v17  ;;  %2889 = vmatmul.mubr.f32.gmra.mxu1 %v471_v59  ;;  %v4478_v59 = vld [vmem:[#allocation39_spill] sm:$0xff] }
  0xc1   :  { %2927 = vmatmul.mubr.f32.vlgmr.msra.gmra.mxu0 %v4472_v43  ;;  %3002 = vmatprep.subr.mxu1 %v4415_v46 }
  0xc2   :  { %3003 = vmatpush3.msra.mxu1 %v4415_v46  ;;  %2891 = vmatprep.mubr.f32.mxu1 %v4473_v54  ;;  %v4481_v46 = vld [vmem:[#allocation45_spill] sm:$0xff] }
  0xc3   :  { %2929 = vmatprep.mubr.f32.mxu0 %v4474_v8  ;;  %3004 = vmatprep.subr.mxu1 %v4417_v60 }
  0xc4   :  { %2892 = vmatmul.mubr.f32.gmra.mxu1 %v4475_v22 }
  0xc5   :  { %2930 = vmatmul.mubr.f32.gmra.mxu0 %v4476_v5  ;;  %3005 = vmatpush3.msra.mxu1 %v4417_v60  ;;  %v4482_v60 = vld [vmem:[#allocation47_spill] sm:$0xff] }
  0xc6   :  { %2932 = vmatprep.mubr.f32.mxu0 %v4477_v33  ;;  %3006 = vmatprep.mubr.f32.mxu1 %v4471_v57 }
  0xc8   :  { %3007 = vmatmul.mubr.f32.vlgmr.msra.gmra.mxu1 %v4472_v43 }
  0xc9   :  { %2933 = vmatmul.mubr.f32.gmra.mxu0 %v4478_v59  ;;  %3009 = vmatprep.mubr.f32.mxu1 %v4474_v8 }
  0xca   :  { %2935 = vmatprep.mubr.f32.mxu0 %v4479_v26 }
  0xcc   :  { %3010 = vmatmul.mubr.f32.gmra.mxu1 %v4476_v5 }
  0xcd   :  { %2936 = vmatmul.mubr.f32.gmra.mxu0 %v4480_v51  ;;  %3012 = vmatprep.mubr.f32.mxu1 %v4477_v33 }
  0xce   :  { %2938 = vmatprep.mubr.f32.mxu0 %v4481_v46 }
  0xd0   :  { %3013 = vmatmul.mubr.f32.gmra.mxu1 %v4478_v59 }
  0xd1   :  { %2939 = vmatmul.mubr.f32.gmra.mxu0 %v4482_v60  ;;  %3015 = vmatprep.mubr.f32.mxu1 %v4479_v26 }
  0xd2   :  { %2941 = vmatprep.mubr.f32.mxu0 %v4483_v32 }
  0xd4   :  { %3016 = vmatmul.mubr.f32.gmra.mxu1 %v4480_v51 }
  0xd5   :  { %2942 = vmatmul.mubr.f32.gmra.mxu0 %v4484_v28  ;;  %3018 = vmatprep.mubr.f32.mxu1 %v4481_v46 }
  0xd6   :  { %2944 = vmatprep.mubr.f32.mxu0 %v4485_v42 }
  0xd8   :  { %3019 = vmatmul.mubr.f32.gmra.mxu1 %v4482_v60 }
  0xd9   :  { %2945 = vmatmul.mubr.f32.gmra.mxu0 %v4486_v9  ;;  %3021 = vmatprep.mubr.f32.mxu1 %v4483_v32 }
  0xda   :  { %2947 = vmatprep.mubr.f32.mxu0 %v4487_v62 }
  0xdc   :  { %3022 = vmatmul.mubr.f32.gmra.mxu1 %v4484_v28 }
  0xdd   :  { %2948 = vmatmul.mubr.f32.gmra.mxu0 %v3474_v25  ;;  %3024 = vmatprep.mubr.f32.mxu1 %v4485_v42 }
  0xde   :  { %2950 = vmatprep.mubr.f32.mxu0 %v4488_v0 }
  0xe0   :  { %3025 = vmatmul.mubr.f32.gmra.mxu1 %v4486_v9 }
  0xe1   :  { %2951 = vmatmul.mubr.f32.gmra.mxu0 %v3498_v18  ;;  %3027 = vmatprep.mubr.f32.mxu1 %v4487_v62 }
  0xe2   :  { %2953 = vmatprep.mubr.f32.mxu0 %v3510_v1 }
  0xe4   :  { %3028 = vmatmul.mubr.f32.gmra.mxu1 %v3474_v25 }
  0xe5   :  { %2954 = vmatmul.mubr.f32.gmra.mxu0 %v3522_v31  ;;  %3030 = vmatprep.mubr.f32.mxu1 %v4488_v0 }
  0xe6   :  { %2956 = vmatprep.mubr.f32.mxu0 %v3534_v39 }
  0xe8   :  { %3031 = vmatmul.mubr.f32.gmra.mxu1 %v3498_v18 }
  0xe9   :  { %2957 = vmatmul.mubr.f32.gmra.mxu0 %v3546_v15  ;;  %3033 = vmatprep.mubr.f32.mxu1 %v3510_v1 }
  0xea   :  { %2959 = vmatprep.mubr.f32.mxu0 %v3550_v49 }
  0xec   :  { %3034 = vmatmul.mubr.f32.gmra.mxu1 %v3522_v31 }
  0xed   :  { %2960 = vmatmul.mubr.f32.gmra.mxu0 %v3562_v19  ;;  %3036 = vmatprep.mubr.f32.mxu1 %v3534_v39 }
  0xee   :  { %2962 = vmatprep.mubr.f32.mxu0 %v3582_v30 }
  0xf0   :  { %3037 = vmatmul.mubr.f32.gmra.mxu1 %v3546_v15 }
  0xf1   :  { %2963 = vmatmul.mubr.f32.gmra.mxu0 %v3594_v36  ;;  %3039 = vmatprep.mubr.f32.mxu1 %v3550_v49 }
  0xf2   :  { %2965 = vmatprep.mubr.f32.mxu0 %v3606_v35 }
  0xf4   :  { %3040 = vmatmul.mubr.f32.gmra.mxu1 %v3562_v19 }
  0xf5   :  { %3042 = vmatprep.mubr.f32.mxu1 %v3582_v30  ;;  %2966 = vmatmul.mubr.f32.gmra.mxu0 %v3618_v44 }
  0xf6   :  { %2968 = vmatprep.mubr.f32.mxu0 %v3630_v38 }
  0xf8   :  { %3043 = vmatmul.mubr.f32.gmra.mxu1 %v3594_v36  ;;  %v3966_v36 = vld [vmem:[%s4227_s2] ss:$0 sm:$0xff]  ;;  %s3131_s2 = smov [#allocation7]  }
  0xf9   :  { %3045 = vmatprep.mubr.f32.mxu1 %v3606_v35  ;;  %2969 = vmatmul.mubr.f32.gmra.mxu0 %v3642_v56  ;;  %s2272_s24 = sshll.u32 %s3131_s2, 4  ;;  %s2273_s24 = int_to_ptr.vmem [resolvable:$true] %s2272_s24 }
  0xfa   :  { %2971 = vmatprep.mubr.f32.mxu0 %v3654_v58  ;;  %s3100_s25 = scalar_lea.vmem %s2273_s24, 4096  ;;  %p3105_p11 = scmp.lt.s32.totalorder %s2273_s24, %s2273_s24 }
  0xfb   :  { %p3101_p10 = scmp.ne.s32.totalorder %s2273_s24, %s3100_s25  ;;  %p3106_p12 = scmp.lt.s32.totalorder %s3100_s25, %s3100_s25 }
  0xfc   :  { %3046 = vmatmul.mubr.f32.gmra.mxu1 %v3618_v44 }
  0xfd   :  { %3048 = vmatprep.mubr.f32.mxu1 %v3630_v38  ;;  %2972 = vmatmul.mubr.f32.gmra.mxu0 %v3666_v41  ;;  %p3107_p13 = por %p3106_p12, %p3105_p11 }
  0xff   :  { %v2608_v18 = vpop.f32.mrf.mxu0  ;;  %p3108_p0 = pnand %p3107_p13, %p3101_p10 }
 0x100   :  { %3049 = vmatmul.mubr.f32.gmra.mxu1 %v3642_v56  ;;  %v196_v44 = vadd.f32 %v2608_v18, %v3966_v36 }
 0x101   :  { %v185_v1 = vpop.f32.mrf.mxu0  ;;  %3051 = vmatprep.mubr.f32.mxu1 %v3654_v58 }
 0x102   :  { %v186_v39 = vadd.f32 %v3966_v36, %v185_v1 }
 0x103   :  { %v2611_v25 = vpop.f32.mrf.mxu0 }
 0x104   :  { %3052 = vmatmul.mubr.f32.gmra.mxu1 %v3666_v41  ;;  %v216_v35 = vadd.f32 %v2611_v25, %v3966_v36 }
 0x105   :  { %v205_v31 = vpop.f32.mrf.mxu0 }
 0x106   :  { %v206_v56 = vadd.f32 %v3966_v36, %v205_v31 }
 0x107   :  { %v2614_v15 = vpop.f32.mrf.mxu0 }
 0x108   :  { %v2688_v49 = vpop.f32.mrf.mxu1  ;;  %v236_v41 = vadd.f32 %v2614_v15, %v3966_v36 }
 0x109   :  { %v3972_v19 = vadd.f32 %v2688_v49, %v196_v44  ;;  %v225_v38 = vpop.f32.mrf.mxu0 }
 0x10a   :  { %v646_v30 = vpop.f32.mrf.mxu1  ;;  %v226_v11 = vadd.f32 %v3966_v36, %v225_v38 }
 0x10b   :  { %v3975_v58 = vadd.f32 %v646_v30, %v186_v39  ;;  %v2617_v12 = vpop.f32.mrf.mxu0 }
 0x10c   :  { %v2691_v10 = vpop.f32.mrf.mxu1  ;;  %v256_v14 = vadd.f32 %v2617_v12, %v3966_v36 }
 0x10d   :  { %v3978_v21 = vadd.f32 %v2691_v10, %v216_v35  ;;  %v245_v63 = vpop.f32.mrf.mxu0 }
 0x10e   :  { %v658_v7 = vpop.f32.mrf.mxu1  ;;  %v246_v24 = vadd.f32 %v3966_v36, %v245_v63 }
 0x10f   :  { %v3981_v37 = vadd.f32 %v658_v7, %v206_v56  ;;  %v2620_v3 = vpop.f32.mrf.mxu0 }
 0x110   :  { %v2694_v16 = vpop.f32.mrf.mxu1  ;;  %v276_v40 = vadd.f32 %v2620_v3, %v3966_v36 }
 0x111   :  { %v3984_v29 = vadd.f32 %v2694_v16, %v236_v41  ;;  %v265_v13 = vpop.f32.mrf.mxu0 }
 0x112   :  { %v670_v55 = vpop.f32.mrf.mxu1  ;;  %v266_v61 = vadd.f32 %v3966_v36, %v265_v13 }
 0x113   :  { %v3987_v4 = vadd.f32 %v670_v55, %v226_v11  ;;  %v2623_v2 = vpop.f32.mrf.mxu0 }
 0x114   :  { %v2697_v27 = vpop.f32.mrf.mxu1  ;;  %v296_v20 = vadd.f32 %v2623_v2, %v3966_v36 }
 0x115   :  { %v3990_v53 = vadd.f32 %v2697_v27, %v256_v14  ;;  %v285_v34 = vpop.f32.mrf.mxu0 }
 0x116   :  { %v682_v52 = vpop.f32.mrf.mxu1  ;;  %v286_v17 = vadd.f32 %v3966_v36, %v285_v34 }
 0x117   :  { %v3993_v45 = vadd.f32 %v682_v52, %v246_v24  ;;  %v2626_v50 = vpop.f32.mrf.mxu0 }
 0x118   :  { %v2700_v23 = vpop.f32.mrf.mxu1  ;;  %v316_v8 = vadd.f32 %v2626_v50, %v3966_v36 }
 0x119   :  { %v3996_v48 = vadd.f32 %v2700_v23, %v276_v40  ;;  %v305_v47 = vpop.f32.mrf.mxu0 }
 0x11a   :  { %v694_v6 = vpop.f32.mrf.mxu1  ;;  %v306_v59 = vadd.f32 %v3966_v36, %v305_v47 }
 0x11b   :  { %v3999_v57 = vadd.f32 %v694_v6, %v266_v61  ;;  %v2629_v43 = vpop.f32.mrf.mxu0 }
 0x11c   :  { %v2703_v54 = vpop.f32.mrf.mxu1  ;;  %v336_v60 = vadd.f32 %v2629_v43, %v3966_v36 }
 0x11d   :  { %v4002_v22 = vadd.f32 %v2703_v54, %v296_v20  ;;  %v325_v5 = vpop.f32.mrf.mxu0 }
 0x11e   :  { %v706_v33 = vpop.f32.mrf.mxu1  ;;  %v326_v9 = vadd.f32 %v3966_v36, %v325_v5 }
 0x11f   :  { %v4005_v26 = vadd.f32 %v706_v33, %v286_v17  ;;  %v2632_v51 = vpop.f32.mrf.mxu0 }
 0x120   :  { %v2706_v46 = vpop.f32.mrf.mxu1  ;;  %v356_v1 = vadd.f32 %v2632_v51, %v3966_v36 }
 0x121   :  { %v4008_v32 = vadd.f32 %v2706_v46, %v316_v8  ;;  %v345_v28 = vpop.f32.mrf.mxu0 }
 0x122   :  { %v718_v42 = vpop.f32.mrf.mxu1  ;;  %v346_v39 = vadd.f32 %v3966_v36, %v345_v28 }
 0x123   :  { %v4011_v62 = vadd.f32 %v718_v42, %v306_v59  ;;  %v2635_v0 = vpop.f32.mrf.mxu0 }
 0x124   :  { %v2709_v18 = vpop.f32.mrf.mxu1  ;;  %v376_v38 = vadd.f32 %v2635_v0, %v3966_v36 }
 0x125   :  { %v4014_v25 = vadd.f32 %v2709_v18, %v336_v60  ;;  %v365_v44 = vpop.f32.mrf.mxu0 }
 0x126   :  { %v730_v31 = vpop.f32.mrf.mxu1  ;;  %v366_v10 = vadd.f32 %v3966_v36, %v365_v44 }
 0x127   :  { %v4017_v15 = vadd.f32 %v730_v31, %v326_v9  ;;  %v2638_v49 = vpop.f32.mrf.mxu0 }
 0x128   :  { %v2712_v35 = vpop.f32.mrf.mxu1  ;;  %v396_v11 = vadd.f32 %v2638_v49, %v3966_v36 }
 0x129   :  { %v4020_v30 = vadd.f32 %v2712_v35, %v356_v1  ;;  %v385_v56 = vpop.f32.mrf.mxu0 }
 0x12a   :  { %v742_v12 = vpop.f32.mrf.mxu1  ;;  %v386_v13 = vadd.f32 %v3966_v36, %v385_v56  ;;  %v3130_v56 = vmov 0.0  }
 0x12b   :  { %v4023_v41 = vadd.f32 %v742_v12, %v346_v39  ;;  %v2641_v63 = vpop.f32.mrf.mxu0  ;;  %2260 = vst [vmem:[#allocation7 + $0xc8] sm:$0xff] %v3130_v56  ;;  %2261 = vst [vmem:[#allocation7 + $0xd0] sm:$0xff] %v3130_v56 }
 0x12c   :  { %v2715_v7 = vpop.f32.mrf.mxu1  ;;  %v416_v27 = vadd.f32 %v2641_v63, %v3966_v36  ;;  %2262 = vst [vmem:[#allocation7 + $0xd8] sm:$0xff] %v3130_v56  ;;  %2263 = vst [vmem:[#allocation7 + $0xe0] sm:$0xff] %v3130_v56 }
 0x12d   :  { %v4026_v3 = vadd.f32 %v2715_v7, %v376_v38  ;;  %v405_v16 = vpop.f32.mrf.mxu0  ;;  %2264 = vst [vmem:[#allocation7 + $0xe8] sm:$0xff] %v3130_v56  ;;  %2265 = vst [vmem:[#allocation7 + $0xf0] sm:$0xff] %v3130_v56 }
 0x12e   :  { %v754_v14 = vpop.f32.mrf.mxu1  ;;  %v406_v61 = vadd.f32 %v3966_v36, %v405_v16  ;;  %2266 = vst [vmem:[#allocation7 + $0xf8] sm:$0xff] %v3130_v56 }
 0x12f   :  { %v4029_v55 = vadd.f32 %v754_v14, %v366_v10  ;;  %v2644_v24 = vpop.f32.mrf.mxu0 }
 0x130   :  { %v2718_v2 = vpop.f32.mrf.mxu1 }
 0x131   :  { %v4032_v40 = vadd.f32 %v2718_v2, %v396_v11  ;;  %v425_v34 = vpop.f32.mrf.mxu0 }
 0x132   :  { %v766_v52 = vpop.f32.mrf.mxu1  ;;  %v426_v43 = vadd.f32 %v3966_v36, %v425_v34 }
 0x133   :  { %v4035_v50 = vadd.f32 %v766_v52, %v386_v13  ;;  %v2647_v23 = vpop.f32.mrf.mxu0 }
 0x134   :  { %v2721_v20 = vpop.f32.mrf.mxu1 }
 0x135   :  { %v4037_v47 = vadd.f32 %v2721_v20, %v416_v27  ;;  %v445_v6 = vpop.f32.mrf.mxu0 }
 0x136   :  { %v778_v17 = vpop.f32.mrf.mxu1 }
 0x137   :  { %v4040_v54 = vadd.f32 %v778_v17, %v406_v61  ;;  %v2650_v8 = vpop.f32.mrf.mxu0 }
 0x138   :  { %v2724_v5 = vpop.f32.mrf.mxu1 }
 0x139   :  { %v465_v33 = vpop.f32.mrf.mxu0 }
 0x13a   :  { %v790_v59 = vpop.f32.mrf.mxu1 }
 0x13b   :  { %v4042_v51 = vadd.f32 %v790_v59, %v426_v43  ;;  %v2653_v46 = vpop.f32.mrf.mxu0 }
 0x13c   :  { %v2727_v60 = vpop.f32.mrf.mxu1 }
 0x13d   :  { %v485_v28 = vpop.f32.mrf.mxu0 }
 0x13e   :  { %v802_v42 = vpop.f32.mrf.mxu1 }
 0x140   :  { %v2730_v9 = vpop.f32.mrf.mxu1  ;;  %v2768_v0 = vpop.f32.mrf.mxu0 }
 0x141   :  { %v4045_v18 = vadd.f32 %v2768_v0, %v3972_v19 }
 0x142   :  { %v814_v1 = vpop.f32.mrf.mxu1  ;;  %v936_v44 = vpop.f32.mrf.mxu0 }
 0x143   :  { %v4048_v36 = vadd.f32 %v936_v44, %v3975_v58 }
 0x144   :  { %v2733_v31 = vpop.f32.mrf.mxu1  ;;  %v2771_v39 = vpop.f32.mrf.mxu0 }
 0x145   :  { %v4051_v49 = vadd.f32 %v2771_v39, %v3978_v21 }
 0x146   :  { %v826_v35 = vpop.f32.mrf.mxu1  ;;  %v950_v38 = vpop.f32.mrf.mxu0 }
 0x147   :  { %v4054_v19 = vadd.f32 %v950_v38, %v3981_v37 }
 0x148   :  { %v2774_v58 = vpop.f32.mrf.mxu0  ;;  %v4056_v12 = vpop.f32.mrf.mxu1 }
 0x149   :  { %v4059_v10 = vadd.f32 %v2774_v58, %v3984_v29 }
 0x14a   :  { %v964_v21 = vpop.f32.mrf.mxu0  ;;  %v4061_v63 = vpop.f32.mrf.mxu1 }
 0x14b   :  { %v4064_v7 = vadd.f32 %v964_v21, %v3987_v4 }
 0x14c   :  { %v2777_v11 = vpop.f32.mrf.mxu0  ;;  %v4066_v16 = vpop.f32.mrf.mxu1 }
 0x14d   :  { %v4069_v14 = vadd.f32 %v2777_v11, %v3990_v53 }
 0x14e   :  { %v978_v37 = vpop.f32.mrf.mxu0  ;;  %v4071_v13 = vpop.f32.mrf.mxu1 }
 0x14f   :  { %v4074_v24 = vadd.f32 %v978_v37, %v3993_v45 }
 0x150   :  { %v2780_v29 = vpop.f32.mrf.mxu0  ;;  %v4076_v2 = vpop.f32.mrf.mxu1 }
 0x151   :  { %v4079_v27 = vadd.f32 %v2780_v29, %v3996_v48 }
 0x152   :  { %v992_v4 = vpop.f32.mrf.mxu0  ;;  %v4081_v34 = vpop.f32.mrf.mxu1 }
 0x153   :  { %v4084_v52 = vadd.f32 %v992_v4, %v3999_v57 }
 0x154   :  { %v2783_v53 = vpop.f32.mrf.mxu0  ;;  %v4086_v61 = vpop.f32.mrf.mxu1 }
 0x155   :  { %v4089_v23 = vadd.f32 %v2783_v53, %v4002_v22 }
 0x156   :  { %v1006_v45 = vpop.f32.mrf.mxu0  ;;  %v4091_v20 = vpop.f32.mrf.mxu1 }
 0x157   :  { %v4094_v6 = vadd.f32 %v1006_v45, %v4005_v26 }
 0x158   :  { %v2786_v48 = vpop.f32.mrf.mxu0  ;;  %v4096_v17 = vpop.f32.mrf.mxu1 }
 0x159   :  { %v4099_v43 = vadd.f32 %v2786_v48, %v4008_v32 }
 0x15a   :  { %v1020_v57 = vpop.f32.mrf.mxu0  ;;  %v4101_v8 = vpop.f32.mrf.mxu1 }
 0x15b   :  { %v4104_v5 = vadd.f32 %v1020_v57, %v4011_v62 }
 0x15c   :  { %v2789_v22 = vpop.f32.mrf.mxu0  ;;  %v4106_v33 = vpop.f32.mrf.mxu1 }
 0x15d   :  { %v4109_v59 = vadd.f32 %v2789_v22, %v4014_v25 }
 0x15e   :  { %v1034_v26 = vpop.f32.mrf.mxu0  ;;  %v4111_v46 = vpop.f32.mrf.mxu1 }
 0x15f   :  { %v4114_v60 = vadd.f32 %v1034_v26, %v4017_v15 }
 0x160   :  { %v2792_v32 = vpop.f32.mrf.mxu0  ;;  %v4116_v28 = vpop.f32.mrf.mxu1 }
 0x161   :  { %v4119_v42 = vadd.f32 %v2792_v32, %v4020_v30 }
 0x162   :  { %v1048_v62 = vpop.f32.mrf.mxu0  ;;  %v4121_v9 = vpop.f32.mrf.mxu1 }
 0x163   :  { %v4124_v0 = vadd.f32 %v1048_v62, %v4023_v41 }
 0x164   :  { %v2795_v25 = vpop.f32.mrf.mxu0  ;;  %v4126_v1 = vpop.f32.mrf.mxu1 }
 0x165   :  { %v4129_v44 = vadd.f32 %v2795_v25, %v4026_v3 }
 0x166   :  { %v1062_v15 = vpop.f32.mrf.mxu0  ;;  %v4131_v31 = vpop.f32.mrf.mxu1 }
 0x167   :  { %v4134_v39 = vadd.f32 %v1062_v15, %v4029_v55 }
 0x168   :  { %v2798_v30 = vpop.f32.mrf.mxu0  ;;  %v4136_v35 = vpop.f32.mrf.mxu1 }
 0x169   :  { %v4139_v38 = vadd.f32 %v2798_v30, %v4032_v40 }
 0x16a   :  { %v1076_v41 = vpop.f32.mrf.mxu0  ;;  %v4141_v56 = vpop.f32.mrf.mxu1 }
 0x16b   :  { %v4144_v58 = vadd.f32 %v1076_v41, %v4035_v50 }
 0x16c   :  { %v2801_v3 = vpop.f32.mrf.mxu0  ;;  %v4146_v21 = vpop.f32.mrf.mxu1 }
 0x16d   :  { %v4149_v11 = vadd.f32 %v2801_v3, %v4037_v47 }
 0x16e   :  { %v1090_v55 = vpop.f32.mrf.mxu0  ;;  %v4151_v37 = vpop.f32.mrf.mxu1 }
 0x16f   :  { %v4154_v29 = vadd.f32 %v1090_v55, %v4040_v54 }
 0x170   :  { %v2804_v40 = vpop.f32.mrf.mxu0  ;;  %v4156_v4 = vpop.f32.mrf.mxu1 }
 0x172   :  { %v1104_v53 = vpop.f32.mrf.mxu0  ;;  %v4158_v45 = vpop.f32.mrf.mxu1 }
 0x173   :  { %v4161_v50 = vadd.f32 %v1104_v53, %v4042_v51 }
 0x174   :  { %v2807_v48 = vpop.f32.mrf.mxu0  ;;  %v4163_v57 = vpop.f32.mrf.mxu1 }
 0x175   :  { %4489 = vst [vmem:[#allocation22_spill] sm:$0xff] %v4161_v50  ;;  %v1251_v48 = vadd.f32 %v4056_v12, %v4045_v18 }
 0x176   :  { %v1118_v47 = vpop.f32.mrf.mxu0  ;;  %v4165_v22 = vpop.f32.mrf.mxu1 }
 0x177   :  { %4490 = vst [vmem:[#allocation34_spill] sm:$0xff] %v4165_v22 }
 0x178   :  { %v2810_v26 = vpop.f32.mrf.mxu0  ;;  %v2884_v32 = vpop.f32.mrf.mxu1 }
 0x179   :  { %v1243_v26 = vadd.f32 %v4061_v63, %v4048_v36  ;;  %v1283_v36 = vadd.f32 %v4076_v2, %v4059_v10 }
 0x17a   :  { %v1132_v62 = vpop.f32.mrf.mxu0  ;;  %v4167_v54 = vpop.f32.mrf.mxu1 }
 0x17b   :  { %4491 = vst [vmem:[#allocation38_spill] sm:$0xff] %v4167_v54 }
 0x17c   :  { %v2813_v25 = vpop.f32.mrf.mxu0  ;;  %v2887_v15 = vpop.f32.mrf.mxu1 }
 0x17d   :  { %v1267_v25 = vadd.f32 %v4066_v16, %v4051_v49 }
 0x17e   :  { %v1146_v30 = vpop.f32.mrf.mxu0  ;;  %v1450_v41 = vpop.f32.mrf.mxu1 }
 0x180   :  { %v2890_v3 = vpop.f32.mrf.mxu1 }
 0x181   :  { %v2928_v55 = vpop.f32.mrf.mxu0 }
 0x182   :  { %v1466_v40 = vpop.f32.mrf.mxu1  ;;  %v1616_v32 = vadd.f32 %v2928_v55, %v1251_v48 }
 0x183   :  { %v1609_v51 = vpop.f32.mrf.mxu0  ;;  %v1259_v40 = vadd.f32 %v4071_v13, %v4054_v19 }
 0x184   :  { %v2893_v53 = vpop.f32.mrf.mxu1  ;;  %v1610_v15 = vadd.f32 %v1609_v51, %v1243_v26 }
 0x185   :  { %v2931_v47 = vpop.f32.mrf.mxu0 }
 0x186   :  { %v1482_v50 = vpop.f32.mrf.mxu1  ;;  %v1628_v53 = vadd.f32 %v2931_v47, %v1267_v25 }
 0x187   :  { %v1621_v62 = vpop.f32.mrf.mxu0 }
 0x188   :  { %v3008_v54 = vpop.f32.mrf.mxu1  ;;  %v1622_v63 = vadd.f32 %v1621_v62, %v1259_v40  ;;  %v1315_v40 = vadd.f32 %v4096_v17, %v4079_v27 }
 0x189   :  { %v2934_v30 = vpop.f32.mrf.mxu0  ;;  %v1889_v41 = vadd.f32 %v3008_v54, %v1616_v32  ;;  %v1275_v54 = vadd.f32 %v4081_v34, %v4064_v7  ;;  %v1299_v32 = vadd.f32 %v4086_v61, %v4069_v14 }
 0x18a   :  { %v1882_v3 = vpop.f32.mrf.mxu1  ;;  %v1640_v51 = vadd.f32 %v2934_v30, %v1283_v36 }
 0x18b   :  { %v2073_v18 = vmax.f32 %v1889_v41, 0.0  ;;  %v1633_v12 = vpop.f32.mrf.mxu0  ;;  %v1883_v50 = vadd.f32 %v1882_v3, %v1610_v15 }
 0x18c   :  { %v3011_v22 = vpop.f32.mrf.mxu1  ;;  %v1634_v25 = vadd.f32 %v1633_v12, %v1275_v54 }
 0x18d   :  { %2236 = vst [vmem:[#allocation7 + $0x8] sm:$0xff] %v2073_v18  ;;  %v2072_v55 = vmax.f32 %v1883_v50, 0.0  ;;  %v2937_v48 = vpop.f32.mrf.mxu0  ;;  %v1901_v49 = vadd.f32 %v3011_v22, %v1628_v53  ;;  %v1291_v22 = vadd.f32 %v4091_v20, %v4074_v24  ;;  %v1307_v50 = vadd.f32 %v4101_v8, %v4084_v52 }
 0x18e   :  { %v1894_v16 = vpop.f32.mrf.mxu1  ;;  %v1652_v41 = vadd.f32 %v2937_v48, %v1299_v32  ;;  %v1331_v48 = vadd.f32 %v4106_v33, %v4089_v23 }
 0x18f   :  { %2235 = vst [vmem:[#allocation7] sm:$0xff] %v2072_v55  ;;  %v2075_v19 = vmax.f32 %v1901_v49, 0.0  ;;  %v1645_v13 = vpop.f32.mrf.mxu0  ;;  %v1895_v47 = vadd.f32 %v1894_v16, %v1622_v63 }
 0x190   :  { %v3014_v26 = vpop.f32.mrf.mxu1  ;;  %v1646_v53 = vadd.f32 %v1645_v13, %v1291_v22 }
 0x191   :  { %2238 = vst [vmem:[#allocation7 + $0x18] sm:$0xff] %v2075_v19  ;;  %v2074_v10 = vmax.f32 %v1895_v47, 0.0  ;;  %v2940_v2 = vpop.f32.mrf.mxu0  ;;  %v1913_v62 = vadd.f32 %v3014_v26, %v1640_v51  ;;  %v1323_v51 = vadd.f32 %v4111_v46, %v4094_v6  ;;  %v1347_v26 = vadd.f32 %v4116_v28, %v4099_v43 }
 0x192   :  { %v1906_v15 = vpop.f32.mrf.mxu1  ;;  %v1664_v36 = vadd.f32 %v2940_v2, %v1315_v40  ;;  %v1339_v2 = vadd.f32 %v4121_v9, %v4104_v5 }
 0x193   :  { %2237 = vst [vmem:[#allocation7 + $0x10] sm:$0xff] %v2074_v10  ;;  %v2077_v7 = vmax.f32 %v1913_v62, 0.0  ;;  %v1657_v34 = vpop.f32.mrf.mxu0  ;;  %v1907_v30 = vadd.f32 %v1906_v15, %v1634_v25 }
 0x194   :  { %v3017_v3 = vpop.f32.mrf.mxu1  ;;  %v1658_v49 = vadd.f32 %v1657_v34, %v1307_v50 }
 0x195   :  { %2240 = vst [vmem:[#allocation7 + $0x28] sm:$0xff] %v2077_v7  ;;  %v2076_v14 = vmax.f32 %v1907_v30, 0.0  ;;  %v2943_v61 = vpop.f32.mrf.mxu0  ;;  %v1925_v18 = vadd.f32 %v3017_v3, %v1652_v41  ;;  %v1363_v41 = vadd.f32 %v4126_v1, %v4109_v59  ;;  %v1355_v3 = vadd.f32 %v4131_v31, %v4114_v60 }
 0x196   :  { %v1918_v12 = vpop.f32.mrf.mxu1  ;;  %v1676_v19 = vadd.f32 %v2943_v61, %v1331_v48  ;;  %v1379_v61 = vadd.f32 %v4136_v35, %v4119_v42 }
 0x197   :  { %2239 = vst [vmem:[#allocation7 + $0x20] sm:$0xff] %v2076_v14  ;;  %v2079_v24 = vmax.f32 %v1925_v18, 0.0  ;;  %v1669_v20 = vpop.f32.mrf.mxu0  ;;  %v1919_v63 = vadd.f32 %v1918_v12, %v1646_v53 }
 0x198   :  { %v3020_v55 = vpop.f32.mrf.mxu1  ;;  %v1670_v32 = vadd.f32 %v1669_v20, %v1323_v51 }
 0x199   :  { %2242 = vst [vmem:[#allocation7 + $0x38] sm:$0xff] %v2079_v24  ;;  %v2078_v27 = vmax.f32 %v1919_v63, 0.0  ;;  %v2946_v17 = vpop.f32.mrf.mxu0  ;;  %v1937_v16 = vadd.f32 %v3020_v55, %v1664_v36  ;;  %v1371_v36 = vadd.f32 %v4141_v56, %v4124_v0  ;;  %v1395_v55 = vadd.f32 %v4146_v21, %v4129_v44 }
 0x19a   :  { %v1930_v54 = vpop.f32.mrf.mxu1  ;;  %v1688_v62 = vadd.f32 %v2946_v17, %v1347_v26  ;;  %v1387_v17 = vadd.f32 %v4151_v37, %v4134_v39 }
 0x19b   :  { %2241 = vst [vmem:[#allocation7 + $0x30] sm:$0xff] %v2078_v27  ;;  %v2081_v52 = vmax.f32 %v1937_v16, 0.0  ;;  %v1681_v8 = vpop.f32.mrf.mxu0  ;;  %v1931_v13 = vadd.f32 %v1930_v54, %v1658_v49 }
 0x19c   :  { %v3023_v47 = vpop.f32.mrf.mxu1  ;;  %v1682_v7 = vadd.f32 %v1681_v8, %v1339_v2 }
 0x19d   :  { %2244 = vst [vmem:[#allocation7 + $0x48] sm:$0xff] %v2081_v52  ;;  %v2080_v23 = vmax.f32 %v1931_v13, 0.0  ;;  %v2949_v33 = vpop.f32.mrf.mxu0  ;;  %v1949_v25 = vadd.f32 %v3023_v47, %v1676_v19  ;;  %v1411_v19 = vadd.f32 %v4156_v4, %v4139_v38  ;;  %v1403_v47 = vadd.f32 %v4158_v45, %v4144_v58 }
 0x19e   :  { %v1942_v10 = vpop.f32.mrf.mxu1  ;;  %v1700_v40 = vadd.f32 %v2949_v33, %v1363_v41  ;;  %v1427_v33 = vadd.f32 %v4163_v57, %v4149_v11 }
 0x19f   :  { %2243 = vst [vmem:[#allocation7 + $0x40] sm:$0xff] %v2080_v23  ;;  %v2083_v6 = vmax.f32 %v1949_v25, 0.0  ;;  %v1693_v46 = vpop.f32.mrf.mxu0  ;;  %v1943_v15 = vadd.f32 %v1942_v10, %v1670_v32 }
 0x1a0   :  { %v3026_v22 = vpop.f32.mrf.mxu1  ;;  %v1694_v18 = vadd.f32 %v1693_v46, %v1355_v3 }
 0x1a1   :  { %2246 = vst [vmem:[#allocation7 + $0x58] sm:$0xff] %v2083_v6  ;;  %v2082_v43 = vmax.f32 %v1943_v15, 0.0  ;;  %v2952_v28 = vpop.f32.mrf.mxu0  ;;  %v1961_v34 = vadd.f32 %v3026_v22, %v1688_v62  ;;  %v4492_v62 = vld [vmem:[#allocation34_spill] sm:$0xff] }
 0x1a2   :  { %v1954_v30 = vpop.f32.mrf.mxu1  ;;  %v1712_v24 = vadd.f32 %v2952_v28, %v1379_v61  ;;  %v1419_v6 = vadd.f32 %v4492_v62, %v4154_v29  ;;  %v4493_v28 = vld [vmem:[#allocation22_spill] sm:$0xff] }
 0x1a3   :  { %2245 = vst [vmem:[#allocation7 + $0x50] sm:$0xff] %v2082_v43  ;;  %v2085_v5 = vmax.f32 %v1961_v34, 0.0  ;;  %v1705_v9 = vpop.f32.mrf.mxu0  ;;  %v1955_v53 = vadd.f32 %v1954_v30, %v1682_v7  ;;  %v4494_v34 = vld [vmem:[#allocation38_spill] sm:$0xff] }
 0x1a4   :  { %v3029_v14 = vpop.f32.mrf.mxu1  ;;  %v1706_v48 = vadd.f32 %v1705_v9, %v1371_v36  ;;  %v1435_v30 = vadd.f32 %v4494_v34, %v4493_v28 }
 0x1a5   :  { %2248 = vst [vmem:[#allocation7 + $0x68] sm:$0xff] %v2085_v5  ;;  %v2084_v59 = vmax.f32 %v1955_v53, 0.0  ;;  %v2955_v1 = vpop.f32.mrf.mxu0  ;;  %v1973_v12 = vadd.f32 %v3029_v14, %v1700_v40 }
 0x1a6   :  { %v1966_v50 = vpop.f32.mrf.mxu1  ;;  %v1724_v16 = vadd.f32 %v2955_v1, %v1395_v55 }
 0x1a7   :  { %2247 = vst [vmem:[#allocation7 + $0x60] sm:$0xff] %v2084_v59  ;;  %v2087_v60 = vmax.f32 %v1973_v12, 0.0  ;;  %v1717_v31 = vpop.f32.mrf.mxu0  ;;  %v1967_v20 = vadd.f32 %v1966_v50, %v1694_v18 }
 0x1a8   :  { %v3032_v63 = vpop.f32.mrf.mxu1  ;;  %v1718_v52 = vadd.f32 %v1717_v31, %v1387_v17 }
 0x1a9   :  { %2250 = vst [vmem:[#allocation7 + $0x78] sm:$0xff] %v2087_v60  ;;  %v2086_v42 = vmax.f32 %v1967_v20, 0.0  ;;  %v2958_v35 = vpop.f32.mrf.mxu0  ;;  %v1985_v49 = vadd.f32 %v3032_v63, %v1712_v24 }
 0x1aa   :  { %v1978_v27 = vpop.f32.mrf.mxu1  ;;  %v1736_v26 = vadd.f32 %v2958_v35, %v1411_v19 }
 0x1ab   :  { %2249 = vst [vmem:[#allocation7 + $0x70] sm:$0xff] %v2086_v42  ;;  %v2089_v0 = vmax.f32 %v1985_v49, 0.0  ;;  %v1729_v56 = vpop.f32.mrf.mxu0  ;;  %v1979_v54 = vadd.f32 %v1978_v27, %v1706_v48 }
 0x1ac   :  { %v3035_v51 = vpop.f32.mrf.mxu1  ;;  %v1730_v25 = vadd.f32 %v1729_v56, %v1403_v47 }
 0x1ad   :  { %2252 = vst [vmem:[#allocation7 + $0x88] sm:$0xff] %v2089_v0  ;;  %v2088_v44 = vmax.f32 %v1979_v54, 0.0  ;;  %v2961_v21 = vpop.f32.mrf.mxu0  ;;  %v1997_v8 = vadd.f32 %v3035_v51, %v1724_v16 }
 0x1ae   :  { %v1990_v13 = vpop.f32.mrf.mxu1  ;;  %v1748_v46 = vadd.f32 %v2961_v21, %v1427_v33 }
 0x1af   :  { %2251 = vst [vmem:[#allocation7 + $0x80] sm:$0xff] %v2088_v44  ;;  %v2091_v39 = vmax.f32 %v1997_v8, 0.0  ;;  %v1741_v37 = vpop.f32.mrf.mxu0  ;;  %v1991_v32 = vadd.f32 %v1990_v13, %v1718_v52 }
 0x1b0   :  { %v3038_v23 = vpop.f32.mrf.mxu1  ;;  %v1742_v41 = vadd.f32 %v1741_v37, %v1419_v6 }
 0x1b1   :  { %2254 = vst [vmem:[#allocation7 + $0x98] sm:$0xff] %v2091_v39  ;;  %v2090_v38 = vmax.f32 %v1991_v32, 0.0  ;;  %v2964_v4 = vpop.f32.mrf.mxu0  ;;  %v2009_v10 = vadd.f32 %v3038_v23, %v1736_v26 }
 0x1b2   :  { %v2002_v2 = vpop.f32.mrf.mxu1 }
 0x1b3   :  { %2253 = vst [vmem:[#allocation7 + $0x90] sm:$0xff] %v2090_v38  ;;  %v2093_v58 = vmax.f32 %v2009_v10, 0.0  ;;  %v1753_v45 = vpop.f32.mrf.mxu0  ;;  %v2003_v15 = vadd.f32 %v2002_v2, %v1730_v25 }
 0x1b4   :  { %v3041_v22 = vpop.f32.mrf.mxu1  ;;  %v1754_v9 = vadd.f32 %v1753_v45, %v1435_v30 }
 0x1b5   :  { %2256 = vst [vmem:[#allocation7 + $0xa8] sm:$0xff] %v2093_v58  ;;  %v2092_v7 = vmax.f32 %v2003_v15, 0.0  ;;  %v2021_v43 = vadd.f32 %v3041_v22, %v1748_v46  ;;  %v2967_v11 = vpop.f32.mrf.mxu0 }
 0x1b6   :  { %v2014_v57 = vpop.f32.mrf.mxu1 }
 0x1b7   :  { %2255 = vst [vmem:[#allocation7 + $0xa0] sm:$0xff] %v2092_v7  ;;  %v2095_v3 = vmax.f32 %v2021_v43, 0.0  ;;  %v2015_v40 = vadd.f32 %v2014_v57, %v1742_v41  ;;  %v1765_v5 = vpop.f32.mrf.mxu0 }
 0x1b8   :  { %v3044_v29 = vpop.f32.mrf.mxu1 }
 0x1b9   :  { %2258 = vst [vmem:[#allocation7 + $0xb8] sm:$0xff] %v2095_v3  ;;  %v2094_v53 = vmax.f32 %v2015_v40, 0.0  ;;  %v2970_v14 = vpop.f32.mrf.mxu0 }
 0x1ba   :  { %v2026_v61 = vpop.f32.mrf.mxu1 }
 0x1bb   :  { %2257 = vst [vmem:[#allocation7 + $0xb0] sm:$0xff] %v2094_v53  ;;  %v2027_v18 = vadd.f32 %v2026_v61, %v1754_v9  ;;  %v1777_v59 = vpop.f32.mrf.mxu0 }
 0x1bc   :  { %v3047_v1 = vpop.f32.mrf.mxu1 }
 0x1bd   :  { %v2096_v12 = vmax.f32 %v2027_v18, 0.0  ;;  %v2973_v50 = vpop.f32.mrf.mxu0 }
 0x1be   :  { %v2038_v36 = vpop.f32.mrf.mxu1 }
 0x1bf   :  { %2259 = vst [vmem:[#allocation7 + $0xc0] sm:$0xff] %v2096_v12  ;;  %v1789_v24 = vpop.f32.mrf.mxu0 }
 0x1c0   :  { %v3050_v60 = vpop.f32.mrf.mxu1 }
 0x1c1   :  { %3111 = shalt.err (!%p3108_p0)
}
 0x1c2   :  { %2278 = dma.vmem_to_hbm [thread:$0]  %s2273_s24, 4096, %s4228_s3, [#allocation4], %s3127_s15, %s3127_s15, %s3128_s16   ;;  %v2050_v31 = vpop.f32.mrf.mxu1 }
 0x1c4   :  { %v3053_v20 = vpop.f32.mrf.mxu1 }
 0x1c6   :  { %v2062_v63 = vpop.f32.mrf.mxu1 }
 0x1c7   :  { %3124 = dma.done.wait [#allocation4], 4096  }
 0x1c8   :  { %3125 = vsyncadd [#allocation4], 4294963200 }
 0x1c9   :  { %2282 = vsyncpa [#allocation3], 1 }
 0x1ca   :  { %2283 = vsyncpa [#allocation6], 1 }
 0x1cb   :  { %2284 = vsyncpa [#allocation4], 1 }

// kernel: tpu_custom_call.1
= control target key start
LH: loop header
LB: loop body
LE: loop exit
PB: predicated region body
PF: predicated region fallthrough
CT: control target
= control target key end

     0   :  { %8 = vsyncpa [#allocation3], 0  ;;  %s843_s0 = inlined_call_operand.hbm [shape: f32[256,128], index: 0, kind: input, shape index: {}]   ;;  %s844_s1 = inlined_call_operand.hbm [shape: f32[128,128], index: 1, kind: input, shape index: {}]   ;;  %s845_s2 = inlined_call_operand.vmem [shape: f32[1,128], index: 2, kind: input, shape index: {}]   ;;  %s846_s3 = inlined_call_operand.hbm [shape: f32[256,128], index: 3, kind: output, shape index: {}]  }
   0x1   :  { %9 = vsyncpa [#allocation6], 0 }
   0x2   :  { %10 = vsyncpa [#allocation4], 0  ;;  %s769_s12 = smov [#allocation2]  }
   0x3   :  { %s16_s13 = sshll.u32 %s769_s12, 4  ;;  %s17_s13 = int_to_ptr.vmem [resolvable:$true] %s16_s13 }
   0x4   :  { %s711_s14 = scalar_lea.vmem %s17_s13, 4096  ;;  %p716_p1 = scmp.lt.s32.totalorder %s17_s13, %s17_s13 }
   0x5   :  { %p712_p0 = scmp.ne.s32.totalorder %s17_s13, %s711_s14  ;;  %p717_p2 = scmp.lt.s32.totalorder %s711_s14, %s711_s14 }
   0x7   :  { %p718_p3 = por %p717_p2, %p716_p1 }
   0x9   :  { %p719_p4 = pnand %p718_p3, %p712_p0 }
   0xb   :  { %722 = shalt.err (!%p719_p4)
}
   0xc   :  { %s770_s15 = smov 128   ;;  %s771_s16 = smov 8  }
   0xd   :  { %22 = dma.hbm_to_vmem [thread:$0]  %s843_s0, 4096, %s17_s13, [#allocation3], %s770_s15, %s770_s15, %s771_s16  }
   0xe   :  { %s772_s19 = smov [#allocation5]  }
   0xf   :  { %s28_s20 = sshll.u32 %s772_s19, 4  ;;  %s29_s20 = int_to_ptr.vmem [resolvable:$true] %s28_s20 }
  0x10   :  { %s731_s21 = scalar_lea.vmem %s29_s20, 2048  ;;  %p736_p6 = scmp.lt.s32.totalorder %s29_s20, %s29_s20 }
  0x11   :  { %p732_p5 = scmp.ne.s32.totalorder %s29_s20, %s731_s21  ;;  %p737_p7 = scmp.lt.s32.totalorder %s731_s21, %s731_s21 }
  0x13   :  { %p738_p8 = por %p737_p7, %p736_p6 }
  0x15   :  { %p739_p9 = pnand %p738_p8, %p732_p5 }
  0x17   :  { %742 = shalt.err (!%p739_p9)
}
  0x18   :  { %34 = dma.hbm_to_vmem [thread:$0]  %s844_s1, 2048, %s29_s20, [#allocation6], %s770_s15, %s770_s15, %s771_s16  }
  0x19   :  { %763 = dma.done.wait [#allocation3], 4096  }
  0x1a   :  { %764 = vsyncadd [#allocation3], 4294963200 }
  0x1b   :  { %765 = dma.done.wait [#allocation6], 2048  }
  0x1c   :  { %766 = vsyncadd [#allocation6], 4294965248  ;;  %v90_v0 = vld [vmem:[#allocation5 + $0x78] sm:$0xff]  ;;  %v89_v1 = vld [vmem:[#allocation5 + $0x70] sm:$0xff]  ;;  %v773_v48 = vmov 0.0  }
  0x1d   :  { %585 = vmatprep.subr.mxu0 %v90_v0  ;;  %665 = vmatprep.subr.mxu1 %v90_v0  ;;  %v88_v2 = vld [vmem:[#allocation5 + $0x68] sm:$0xff]  ;;  %v87_v3 = vld [vmem:[#allocation5 + $0x60] sm:$0xff]  ;;  %v86_v4 = vld [vmem:[#allocation5 + $0x58] sm:$0xff]  ;;  %511 = vst [vmem:[#allocation7 + $0xc8] sm:$0xff] %v773_v48 }
  0x1e   :  { %586 = vmatpush3.msra.mxu0 %v90_v0  ;;  %681 = vmatpush3.msra.mxu1 %v90_v0  ;;  %v85_v5 = vld [vmem:[#allocation5 + $0x50] sm:$0xff]  ;;  %v84_v6 = vld [vmem:[#allocation5 + $0x48] sm:$0xff]  ;;  %v83_v7 = vld [vmem:[#allocation5 + $0x40] sm:$0xff]  ;;  %512 = vst [vmem:[#allocation7 + $0xd0] sm:$0xff] %v773_v48 }
  0x1f   :  { %587 = vmatprep.subr.mxu0 %v89_v1  ;;  %666 = vmatprep.subr.mxu1 %v89_v1  ;;  %v82_v8 = vld [vmem:[#allocation5 + $0x38] sm:$0xff]  ;;  %v81_v9 = vld [vmem:[#allocation5 + $0x30] sm:$0xff]  ;;  %v80_v10 = vld [vmem:[#allocation5 + $0x28] sm:$0xff]  ;;  %513 = vst [vmem:[#allocation7 + $0xd8] sm:$0xff] %v773_v48 }
  0x20   :  { %588 = vmatpush3.msra.mxu0 %v89_v1  ;;  %682 = vmatpush3.msra.mxu1 %v89_v1  ;;  %v79_v11 = vld [vmem:[#allocation5 + $0x20] sm:$0xff]  ;;  %v78_v12 = vld [vmem:[#allocation5 + $0x18] sm:$0xff]  ;;  %v77_v13 = vld [vmem:[#allocation5 + $0x10] sm:$0xff]  ;;  %514 = vst [vmem:[#allocation7 + $0xe0] sm:$0xff] %v773_v48 }
  0x21   :  { %589 = vmatprep.subr.mxu0 %v88_v2  ;;  %667 = vmatprep.subr.mxu1 %v88_v2  ;;  %v76_v14 = vld [vmem:[#allocation5 + $0x8] sm:$0xff]  ;;  %v43_v15 = vld [vmem:[#allocation2] sm:$0xff]  ;;  %v45_v18 = vld [vmem:[#allocation2 + $0x10] sm:$0xff]  ;;  %515 = vst [vmem:[#allocation7 + $0xe8] sm:$0xff] %v773_v48 }
  0x22   :  { %590 = vmatpush3.msra.mxu0 %v88_v2  ;;  %683 = vmatpush3.msra.mxu1 %v88_v2  ;;  %v75_v16 = vld [vmem:[#allocation5] sm:$0xff]  ;;  %v44_v17 = vld [vmem:[#allocation2 + $0x8] sm:$0xff]  ;;  %v61_v21 = vld [vmem:[#allocation2 + $0x90] sm:$0xff]  ;;  %516 = vst [vmem:[#allocation7 + $0xf0] sm:$0xff] %v773_v48 }
  0x23   :  { %591 = vmatprep.subr.mxu0 %v87_v3  ;;  %668 = vmatprep.subr.mxu1 %v87_v3  ;;  %v59_v19 = vld [vmem:[#allocation2 + $0x80] sm:$0xff]  ;;  %v60_v20 = vld [vmem:[#allocation2 + $0x88] sm:$0xff]  ;;  %v46_v22 = vld [vmem:[#allocation2 + $0x18] sm:$0xff]  ;;  %517 = vst [vmem:[#allocation7 + $0xf8] sm:$0xff] %v773_v48 }
  0x24   :  { %592 = vmatpush3.msra.mxu0 %v87_v3  ;;  %684 = vmatpush3.msra.mxu1 %v87_v3  ;;  %v47_v23 = vld [vmem:[#allocation2 + $0x20] sm:$0xff]  ;;  %v62_v24 = vld [vmem:[#allocation2 + $0x98] sm:$0xff]  ;;  %v48_v26 = vld [vmem:[#allocation2 + $0x28] sm:$0xff] }
  0x25   :  { %593 = vmatprep.subr.mxu0 %v86_v4  ;;  %669 = vmatprep.subr.mxu1 %v86_v4  ;;  %v63_v25 = vld [vmem:[#allocation2 + $0xa0] sm:$0xff]  ;;  %v49_v27 = vld [vmem:[#allocation2 + $0x30] sm:$0xff]  ;;  %v64_v28 = vld [vmem:[#allocation2 + $0xa8] sm:$0xff] }
  0x26   :  { %594 = vmatpush3.msra.mxu0 %v86_v4  ;;  %685 = vmatpush3.msra.mxu1 %v86_v4  ;;  %v65_v29 = vld [vmem:[#allocation2 + $0xb0] sm:$0xff]  ;;  %v50_v30 = vld [vmem:[#allocation2 + $0x38] sm:$0xff]  ;;  %v51_v31 = vld [vmem:[#allocation2 + $0x40] sm:$0xff] }
  0x27   :  { %595 = vmatprep.subr.mxu0 %v85_v5  ;;  %670 = vmatprep.subr.mxu1 %v85_v5  ;;  %v66_v32 = vld [vmem:[#allocation2 + $0xb8] sm:$0xff]  ;;  %v67_v33 = vld [vmem:[#allocation2 + $0xc0] sm:$0xff]  ;;  %v52_v34 = vld [vmem:[#allocation2 + $0x48] sm:$0xff] }
  0x28   :  { %596 = vmatpush3.msra.mxu0 %v85_v5  ;;  %686 = vmatpush3.msra.mxu1 %v85_v5  ;;  %v53_v35 = vld [vmem:[#allocation2 + $0x50] sm:$0xff]  ;;  %v68_v36 = vld [vmem:[#allocation2 + $0xc8] sm:$0xff]  ;;  %v54_v38 = vld [vmem:[#allocation2 + $0x58] sm:$0xff] }
  0x29   :  { %597 = vmatprep.subr.mxu0 %v84_v6  ;;  %671 = vmatprep.subr.mxu1 %v84_v6  ;;  %v69_v37 = vld [vmem:[#allocation2 + $0xd0] sm:$0xff]  ;;  %v55_v39 = vld [vmem:[#allocation2 + $0x60] sm:$0xff]  ;;  %v70_v40 = vld [vmem:[#allocation2 + $0xd8] sm:$0xff] }
  0x2a   :  { %598 = vmatpush3.msra.mxu0 %v84_v6  ;;  %687 = vmatpush3.msra.mxu1 %v84_v6  ;;  %v71_v41 = vld [vmem:[#allocation2 + $0xe0] sm:$0xff]  ;;  %v56_v42 = vld [vmem:[#allocation2 + $0x68] sm:$0xff]  ;;  %v57_v43 = vld [vmem:[#allocation2 + $0x70] sm:$0xff] }
  0x2b   :  { %599 = vmatprep.subr.mxu0 %v83_v7  ;;  %672 = vmatprep.subr.mxu1 %v83_v7  ;;  %v72_v44 = vld [vmem:[#allocation2 + $0xe8] sm:$0xff]  ;;  %v73_v45 = vld [vmem:[#allocation2 + $0xf0] sm:$0xff]  ;;  %v58_v46 = vld [vmem:[#allocation2 + $0x78] sm:$0xff] }
  0x2c   :  { %600 = vmatpush3.msra.mxu0 %v83_v7  ;;  %688 = vmatpush3.msra.mxu1 %v83_v7  ;;  %v74_v47 = vld [vmem:[#allocation2 + $0xf8] sm:$0xff]  ;;  %v810_v49 = vld [vmem:[%s845_s2] ss:$0 sm:$0xff]  ;;  %s774_s2 = smov [#allocation7]  }
  0x2d   :  { %601 = vmatprep.subr.mxu0 %v82_v8  ;;  %673 = vmatprep.subr.mxu1 %v82_v8  ;;  %s523_s24 = sshll.u32 %s774_s2, 4  ;;  %s524_s24 = int_to_ptr.vmem [resolvable:$true] %s523_s24 }
  0x2e   :  { %602 = vmatpush3.msra.mxu0 %v82_v8  ;;  %689 = vmatpush3.msra.mxu1 %v82_v8  ;;  %s743_s25 = scalar_lea.vmem %s524_s24, 4096  ;;  %p748_p11 = scmp.lt.s32.totalorder %s524_s24, %s524_s24 }
  0x2f   :  { %603 = vmatprep.subr.mxu0 %v81_v9  ;;  %674 = vmatprep.subr.mxu1 %v81_v9  ;;  %p744_p10 = scmp.ne.s32.totalorder %s524_s24, %s743_s25  ;;  %p749_p12 = scmp.lt.s32.totalorder %s743_s25, %s743_s25 }
  0x30   :  { %604 = vmatpush3.msra.mxu0 %v81_v9  ;;  %690 = vmatpush3.msra.mxu1 %v81_v9 }
  0x31   :  { %605 = vmatprep.subr.mxu0 %v80_v10  ;;  %675 = vmatprep.subr.mxu1 %v80_v10  ;;  %p750_p13 = por %p749_p12, %p748_p11 }
  0x32   :  { %606 = vmatpush3.msra.mxu0 %v80_v10  ;;  %691 = vmatpush3.msra.mxu1 %v80_v10 }
  0x33   :  { %607 = vmatprep.subr.mxu0 %v79_v11  ;;  %676 = vmatprep.subr.mxu1 %v79_v11  ;;  %p751_p0 = pnand %p750_p13, %p744_p10 }
  0x34   :  { %608 = vmatpush3.msra.mxu0 %v79_v11  ;;  %692 = vmatpush3.msra.mxu1 %v79_v11 }
  0x35   :  { %609 = vmatprep.subr.mxu0 %v78_v12  ;;  %677 = vmatprep.subr.mxu1 %v78_v12 }
  0x36   :  { %610 = vmatpush3.msra.mxu0 %v78_v12  ;;  %693 = vmatpush3.msra.mxu1 %v78_v12 }
  0x37   :  { %611 = vmatprep.subr.mxu0 %v77_v13  ;;  %678 = vmatprep.subr.mxu1 %v77_v13 }
  0x38   :  { %612 = vmatpush3.msra.mxu0 %v77_v13  ;;  %694 = vmatpush3.msra.mxu1 %v77_v13 }
  0x39   :  { %613 = vmatprep.subr.mxu0 %v76_v14  ;;  %617 = vmatprep.mubr.f32.mxu0 %v43_v15 }
  0x3a   :  { %614 = vmatpush3.msra.mxu0 %v76_v14  ;;  %679 = vmatprep.subr.mxu1 %v76_v14 }
  0x3b   :  { %615 = vmatprep.subr.mxu0 %v75_v16  ;;  %695 = vmatpush3.msra.mxu1 %v76_v14 }
  0x3c   :  { %616 = vmatpush3.msra.mxu0 %v75_v16  ;;  %680 = vmatprep.subr.mxu1 %v75_v16 }
  0x3d   :  { %618 = vmatmul.mubr.f32.vlgmr.msra.gmra.mxu0 %v44_v17  ;;  %696 = vmatpush3.msra.mxu1 %v75_v16 }
  0x3e   :  { %620 = vmatprep.mubr.f32.mxu0 %v45_v18  ;;  %641 = vmatprep.mubr.f32.mxu1 %v59_v19 }
  0x3f   :  { %642 = vmatmul.mubr.f32.vlgmr.msra.gmra.mxu1 %v60_v20 }
  0x40   :  { %644 = vmatprep.mubr.f32.mxu1 %v61_v21 }
  0x41   :  { %621 = vmatmul.mubr.f32.gmra.mxu0 %v46_v22 }
  0x42   :  { %623 = vmatprep.mubr.f32.mxu0 %v47_v23 }
  0x43   :  { %645 = vmatmul.mubr.f32.gmra.mxu1 %v62_v24 }
  0x44   :  { %647 = vmatprep.mubr.f32.mxu1 %v63_v25 }
  0x45   :  { %624 = vmatmul.mubr.f32.gmra.mxu0 %v48_v26 }
  0x46   :  { %626 = vmatprep.mubr.f32.mxu0 %v49_v27 }
  0x47   :  { %648 = vmatmul.mubr.f32.gmra.mxu1 %v64_v28 }
  0x48   :  { %650 = vmatprep.mubr.f32.mxu1 %v65_v29 }
  0x49   :  { %627 = vmatmul.mubr.f32.gmra.mxu0 %v50_v30 }
  0x4a   :  { %629 = vmatprep.mubr.f32.mxu0 %v51_v31 }
  0x4b   :  { %651 = vmatmul.mubr.f32.gmra.mxu1 %v66_v32 }
  0x4c   :  { %653 = vmatprep.mubr.f32.mxu1 %v67_v33 }
  0x4d   :  { %630 = vmatmul.mubr.f32.gmra.mxu0 %v52_v34 }
  0x4e   :  { %632 = vmatprep.mubr.f32.mxu0 %v53_v35 }
  0x4f   :  { %654 = vmatmul.mubr.f32.gmra.mxu1 %v68_v36 }
  0x50   :  { %656 = vmatprep.mubr.f32.mxu1 %v69_v37 }
  0x51   :  { %633 = vmatmul.mubr.f32.gmra.mxu0 %v54_v38 }
  0x52   :  { %635 = vmatprep.mubr.f32.mxu0 %v55_v39 }
  0x53   :  { %657 = vmatmul.mubr.f32.gmra.mxu1 %v70_v40 }
  0x54   :  { %659 = vmatprep.mubr.f32.mxu1 %v71_v41 }
  0x55   :  { %636 = vmatmul.mubr.f32.gmra.mxu0 %v56_v42 }
  0x56   :  { %638 = vmatprep.mubr.f32.mxu0 %v57_v43 }
  0x57   :  { %660 = vmatmul.mubr.f32.gmra.mxu1 %v72_v44 }
  0x58   :  { %662 = vmatprep.mubr.f32.mxu1 %v73_v45 }
  0x59   :  { %639 = vmatmul.mubr.f32.gmra.mxu0 %v58_v46 }
  0x5b   :  { %663 = vmatmul.mubr.f32.gmra.mxu1 %v74_v47 }
  0xfd   :  { %v619_v50 = vpop.f32.mrf.mxu0 }
  0xfe   :  { %v170_v51 = vadd.f32 %v619_v50, %v810_v49 }
  0xff   :  { %v164_v52 = vpop.f32.mrf.mxu0  ;;  %v643_v53 = vpop.f32.mrf.mxu1 }
 0x100   :  { %v324_v54 = vmax.f32 %v170_v51, 0.0  ;;  %v165_v55 = vadd.f32 %v810_v49, %v164_v52  ;;  %v250_v56 = vadd.f32 %v643_v53, %v810_v49 }
 0x101   :  { %v622_v57 = vpop.f32.mrf.mxu0  ;;  %v244_v58 = vpop.f32.mrf.mxu1 }
 0x102   :  { %487 = vst [vmem:[#allocation7 + $0x8] sm:$0xff] %v324_v54  ;;  %v323_v59 = vmax.f32 %v165_v55, 0.0  ;;  %v180_v60 = vadd.f32 %v622_v57, %v810_v49  ;;  %v340_v61 = vmax.f32 %v250_v56, 0.0  ;;  %v245_v62 = vadd.f32 %v810_v49, %v244_v58 }
 0x103   :  { %v174_v63 = vpop.f32.mrf.mxu0  ;;  %v646_v0 = vpop.f32.mrf.mxu1 }
 0x104   :  { %486 = vst [vmem:[#allocation7] sm:$0xff] %v323_v59  ;;  %v326_v1 = vmax.f32 %v180_v60, 0.0  ;;  %503 = vst [vmem:[#allocation7 + $0x88] sm:$0xff] %v340_v61  ;;  %v175_v2 = vadd.f32 %v810_v49, %v174_v63  ;;  %v339_v3 = vmax.f32 %v245_v62, 0.0  ;;  %v260_v4 = vadd.f32 %v646_v0, %v810_v49 }
 0x105   :  { %v625_v5 = vpop.f32.mrf.mxu0  ;;  %v254_v6 = vpop.f32.mrf.mxu1 }
 0x106   :  { %489 = vst [vmem:[#allocation7 + $0x18] sm:$0xff] %v326_v1  ;;  %v325_v7 = vmax.f32 %v175_v2, 0.0  ;;  %502 = vst [vmem:[#allocation7 + $0x80] sm:$0xff] %v339_v3  ;;  %v190_v8 = vadd.f32 %v625_v5, %v810_v49  ;;  %v342_v9 = vmax.f32 %v260_v4, 0.0  ;;  %v255_v10 = vadd.f32 %v810_v49, %v254_v6 }
 0x107   :  { %v184_v11 = vpop.f32.mrf.mxu0  ;;  %v649_v12 = vpop.f32.mrf.mxu1 }
 0x108   :  { %488 = vst [vmem:[#allocation7 + $0x10] sm:$0xff] %v325_v7  ;;  %v328_v13 = vmax.f32 %v190_v8, 0.0  ;;  %505 = vst [vmem:[#allocation7 + $0x98] sm:$0xff] %v342_v9  ;;  %v185_v14 = vadd.f32 %v810_v49, %v184_v11  ;;  %v341_v15 = vmax.f32 %v255_v10, 0.0  ;;  %v270_v16 = vadd.f32 %v649_v12, %v810_v49 }
 0x109   :  { %v628_v17 = vpop.f32.mrf.mxu0  ;;  %v264_v18 = vpop.f32.mrf.mxu1 }
 0x10a   :  { %491 = vst [vmem:[#allocation7 + $0x28] sm:$0xff] %v328_v13  ;;  %v327_v19 = vmax.f32 %v185_v14, 0.0  ;;  %504 = vst [vmem:[#allocation7 + $0x90] sm:$0xff] %v341_v15  ;;  %v200_v20 = vadd.f32 %v628_v17, %v810_v49  ;;  %v344_v21 = vmax.f32 %v270_v16, 0.0  ;;  %v265_v22 = vadd.f32 %v810_v49, %v264_v18 }
 0x10b   :  { %v194_v23 = vpop.f32.mrf.mxu0  ;;  %v652_v24 = vpop.f32.mrf.mxu1 }
 0x10c   :  { %490 = vst [vmem:[#allocation7 + $0x20] sm:$0xff] %v327_v19  ;;  %v330_v25 = vmax.f32 %v200_v20, 0.0  ;;  %507 = vst [vmem:[#allocation7 + $0xa8] sm:$0xff] %v344_v21  ;;  %v195_v26 = vadd.f32 %v810_v49, %v194_v23  ;;  %v343_v27 = vmax.f32 %v265_v22, 0.0  ;;  %v280_v28 = vadd.f32 %v652_v24, %v810_v49 }
 0x10d   :  { %v631_v29 = vpop.f32.mrf.mxu0  ;;  %v274_v30 = vpop.f32.mrf.mxu1 }
 0x10e   :  { %493 = vst [vmem:[#allocation7 + $0x38] sm:$0xff] %v330_v25  ;;  %v329_v31 = vmax.f32 %v195_v26, 0.0  ;;  %506 = vst [vmem:[#allocation7 + $0xa0] sm:$0xff] %v343_v27  ;;  %v210_v32 = vadd.f32 %v631_v29, %v810_v49  ;;  %v346_v33 = vmax.f32 %v280_v28, 0.0  ;;  %v275_v34 = vadd.f32 %v810_v49, %v274_v30 }
 0x10f   :  { %v204_v35 = vpop.f32.mrf.mxu0  ;;  %v655_v36 = vpop.f32.mrf.mxu1 }
 0x110   :  { %492 = vst [vmem:[#allocation7 + $0x30] sm:$0xff] %v329_v31  ;;  %v332_v37 = vmax.f32 %v210_v32, 0.0  ;;  %509 = vst [vmem:[#allocation7 + $0xb8] sm:$0xff] %v346_v33  ;;  %v205_v38 = vadd.f32 %v810_v49, %v204_v35  ;;  %v345_v39 = vmax.f32 %v275_v34, 0.0 }
 0x111   :  { %v634_v40 = vpop.f32.mrf.mxu0  ;;  %v284_v41 = vpop.f32.mrf.mxu1 }
 0x112   :  { %495 = vst [vmem:[#allocation7 + $0x48] sm:$0xff] %v332_v37  ;;  %v331_v42 = vmax.f32 %v205_v38, 0.0  ;;  %508 = vst [vmem:[#allocation7 + $0xb0] sm:$0xff] %v345_v39  ;;  %v220_v43 = vadd.f32 %v634_v40, %v810_v49  ;;  %v285_v44 = vadd.f32 %v810_v49, %v284_v41 }
 0x113   :  { %v214_v45 = vpop.f32.mrf.mxu0  ;;  %v658_v46 = vpop.f32.mrf.mxu1 }
 0x114   :  { %494 = vst [vmem:[#allocation7 + $0x40] sm:$0xff] %v331_v42  ;;  %v334_v47 = vmax.f32 %v220_v43, 0.0  ;;  %v215_v48 = vadd.f32 %v810_v49, %v214_v45  ;;  %v347_v50 = vmax.f32 %v285_v44, 0.0 }
 0x115   :  { %v637_v51 = vpop.f32.mrf.mxu0  ;;  %v294_v52 = vpop.f32.mrf.mxu1 }
 0x116   :  { %497 = vst [vmem:[#allocation7 + $0x58] sm:$0xff] %v334_v47  ;;  %v333_v53 = vmax.f32 %v215_v48, 0.0  ;;  %510 = vst [vmem:[#allocation7 + $0xc0] sm:$0xff] %v347_v50  ;;  %v230_v54 = vadd.f32 %v637_v51, %v810_v49 }
 0x117   :  { %v224_v55 = vpop.f32.mrf.mxu0  ;;  %v661_v56 = vpop.f32.mrf.mxu1 }
 0x118   :  { %496 = vst [vmem:[#allocation7 + $0x50] sm:$0xff] %v333_v53  ;;  %v336_v57 = vmax.f32 %v230_v54, 0.0  ;;  %v225_v58 = vadd.f32 %v810_v49, %v224_v55 }
 0x119   :  { %v640_v59 = vpop.f32.mrf.mxu0  ;;  %v304_v60 = vpop.f32.mrf.mxu1 }
 0x11a   :  { %499 = vst [vmem:[#allocation7 + $0x68] sm:$0xff] %v336_v57  ;;  %v335_v61 = vmax.f32 %v225_v58, 0.0  ;;  %v240_v62 = vadd.f32 %v640_v59, %v810_v49 }
 0x11b   :  { %v234_v63 = vpop.f32.mrf.mxu0  ;;  %v664_v0 = vpop.f32.mrf.mxu1 }
 0x11c   :  { %498 = vst [vmem:[#allocation7 + $0x60] sm:$0xff] %v335_v61  ;;  %v338_v1 = vmax.f32 %v240_v62, 0.0  ;;  %v235_v2 = vadd.f32 %v810_v49, %v234_v63 }
 0x11d   :  { %v314_v3 = vpop.f32.mrf.mxu1 }
 0x11e   :  { %501 = vst [vmem:[#allocation7 + $0x78] sm:$0xff] %v338_v1  ;;  %v337_v4 = vmax.f32 %v235_v2, 0.0 }
 0x120   :  { %500 = vst [vmem:[#allocation7 + $0x70] sm:$0xff] %v337_v4 }
 0x121   :  { %754 = shalt.err (!%p751_p0)
}
 0x122   :  { %529 = dma.vmem_to_hbm [thread:$0]  %s524_s24, 4096, %s846_s3, [#allocation4], %s770_s15, %s770_s15, %s771_s16  }
 0x123   :  { %767 = dma.done.wait [#allocation4], 4096  }
 0x124   :  { %768 = vsyncadd [#allocation4], 4294963200 }
 0x125   :  { %533 = vsyncpa [#allocation3], 1 }
 0x126   :  { %534 = vsyncpa [#allocation6], 1 }
 0x127   :  { %535 = vsyncpa [#allocation4], 1 }

</bundles_post_ra>
